<compile_context>
chip_gen: v7x
topology: tpu7x:2x2x1
jax: 0.10.0
libtpu: 0.0.40
codegen_flags: <defaults>
</compile_context>

<pallas_src>
import jax
import jax.numpy as jnp
from jax import lax
from jax.experimental import pallas as pl
from jax.experimental.pallas import tpu as pltpu

_HI = jax.lax.Precision.HIGHEST
_TPAD = 128          # lane-dense padded tag axis
_NEG_BIG = -1e30     # finite pad for log-softmax (never -inf)


def _lstm_tagger_kernel(ids_ref, table_ref, wih_ref, whh_ref, b_ref,
                        wout_ref, bout_ref, out_ref):
    # ids_ref : (S, 1) int32   (batch dim squeezed by BlockSpec)
    # table   : (V, E)  wih: (E, 4H)  whh: (H, 4H)  b: (1, 4H)
    # wout    : (H, TPAD)  bout: (1, TPAD)  out: (S, TPAD)
    S = ids_ref.shape[0]
    V, E = table_ref.shape
    H = whh_ref.shape[0]

    # ---- Fused embedding gather: one-hot(ids) @ table on the MXU -----------
    ids = ids_ref[...]                                        # (S, 1)
    vocab_iota = lax.broadcasted_iota(jnp.int32, (S, V), 1)   # (S, V)
    onehot = (ids == vocab_iota).astype(jnp.float32)          # (S, V)
    emb = jnp.dot(onehot, table_ref[...],
                  preferred_element_type=jnp.float32, precision=_HI)  # (S, E)

    # ---- Input projection + bias for all timesteps (off critical path) -----
    xproj = jnp.dot(emb, wih_ref[...],
                    preferred_element_type=jnp.float32,
                    precision=_HI) + b_ref[...]               # (S, 4H) vreg value

    # ---- Hoisted loop invariants --------------------------------------------
    whh = whh_ref[...]                                        # (H, 4H)
    lane = lax.broadcasted_iota(jnp.int32, (1, 4 * H), 1)
    g_mask = (lane >= 2 * H) & (lane < 3 * H)                 # tanh lanes (g gate)
    # 0.5 pre-scale on sigmoid lanes (i, f, o); 1.0 on tanh lanes (g).
    pre_scale = jnp.where(g_mask, jnp.float32(1.0), jnp.float32(0.5))  # (1, 4H)

    h = jnp.zeros((1, H), jnp.float32)
    c = jnp.zeros((1, H), jnp.float32)
    hs = []

    # ---- Recurrence: h/c live in vregs; one small matmul + one tanh per step
    for t in range(S):
        gates = xproj[t:t + 1, :] + jnp.dot(
            h, whh, preferred_element_type=jnp.float32, precision=_HI)  # (1, 4H)
        # Single full-width EUP push: t = tanh(scale * x)
        t_act = jnp.tanh(gates * pre_scale)
        # sigmoid(x) = 0.5*tanh(x/2) + 0.5 on i/f/o lanes; tanh(x) on g lanes.
        act = jnp.where(g_mask, t_act, 0.5 * t_act + 0.5)
        i_g = act[:, 0 * H:1 * H]
        f_g = act[:, 1 * H:2 * H]
        g_g = act[:, 2 * H:3 * H]
        o_g = act[:, 3 * H:4 * H]
        c = f_g * c + i_g * g_g
        h = o_g * jnp.tanh(c)
        hs.append(h)

    lstm_out = jnp.concatenate(hs, axis=0)                    # (S, H)

    # ---- hidden2tag: (S, H) @ (H, TPAD) + bias ------------------------------
    tag_space = jnp.dot(lstm_out, wout_ref[...],
                        preferred_element_type=jnp.float32,
                        precision=_HI) + bout_ref[...]        # (S, TPAD)

    # ---- log_softmax over the tag axis (padded lanes hold -1e30) ------------
    m = jnp.max(tag_space, axis=1, keepdims=True)
    z = tag_space - m
    lse = jnp.log(jnp.sum(jnp.exp(z), axis=1, keepdims=True))
    out_ref[...] = z - lse


@jax.jit
def lstm_tagger_forward_batch(sentences, params):
    """sentences: (B, S) int32 token ids. Returns (B, S, tagset_size) log-probs."""
    emb_table = params["embedding"]        # (V, E)
    w_ih = params["w_ih"]                  # (4H, E)  PyTorch layout
    w_hh = params["w_hh"]                  # (4H, H)
    b = params["b_ih"] + params["b_hh"]    # (4H,)
    w_out = params["w_out"]                # (T, H)
    b_out = params["b_out"]                # (T,)

    H = w_hh.shape[1]
    T = w_out.shape[0]
    B, S = sentences.shape
    V, E = emb_table.shape

    ids3d = sentences.astype(jnp.int32).reshape(B, S, 1)

    # Pre-transpose weights so every matmul inside the kernel is row-major.
    wih_t = w_ih.T                                         # (E, 4H)
    whh_t = w_hh.T                                         # (H, 4H)
    b2d = b[None, :]                                       # (1, 4H)
    # Lane-dense tag axis: pad weights with zeros, bias with a large finite
    # negative so padded lanes never affect (or NaN) the log-softmax.
    wout_pad = jnp.zeros((H, _TPAD), jnp.float32).at[:, :T].set(w_out.T)
    bout_pad = jnp.full((1, _TPAD), _NEG_BIG, jnp.float32).at[:, :T].set(b_out)

    grid_spec = pltpu.PrefetchScalarGridSpec(
        num_scalar_prefetch=0,
        grid=(B,),
        in_specs=[
            pl.BlockSpec((None, S, 1), lambda bb: (bb, 0, 0)),      # ids (per sentence)
            pl.BlockSpec((V, E), lambda bb: (0, 0)),                # embedding table
            pl.BlockSpec((E, 4 * H), lambda bb: (0, 0)),            # W_ih^T
            pl.BlockSpec((H, 4 * H), lambda bb: (0, 0)),            # W_hh^T
            pl.BlockSpec((1, 4 * H), lambda bb: (0, 0)),            # bias
            pl.BlockSpec((H, _TPAD), lambda bb: (0, 0)),            # W_out^T (padded)
            pl.BlockSpec((1, _TPAD), lambda bb: (0, 0)),            # b_out (padded)
        ],
        out_specs=pl.BlockSpec((None, S, _TPAD), lambda bb: (bb, 0, 0)),
    )

    out = pl.pallas_call(
        _lstm_tagger_kernel,
        out_shape=jax.ShapeDtypeStruct((B, S, _TPAD), jnp.float32),
        grid_spec=grid_spec,
        compiler_params=pltpu.CompilerParams(
            dimension_semantics=("parallel",)),   # sentences split across TCs (v7x)
    )(ids3d, emb_table, wih_t, whh_t, b2d, wout_pad, bout_pad)

    return out[:, :, :T]


def lstm_tagger_forward(sentence, params):
    """Single-sentence API matching the PyTorch module: (S,) -> (S, T)."""
    return lstm_tagger_forward_batch(sentence[None, :], params)[0]


def _reference_forward(sentence, params):
    """Pure-JAX reference of the PyTorch forward pass (for sanity check)."""
    emb = params["embedding"][sentence]
    w_ih, w_hh = params["w_ih"], params["w_hh"]
    b = params["b_ih"] + params["b_hh"]
    H = w_hh.shape[1]

    def step(carry, x_t):
        h, c = carry
        gates = (jnp.dot(x_t, w_ih.T, precision=_HI)
                 + jnp.dot(h, w_hh.T, precision=_HI) + b)
        i = jax.nn.sigmoid(gates[0 * H:1 * H])
        f = jax.nn.sigmoid(gates[1 * H:2 * H])
        g = jnp.tanh(gates[2 * H:3 * H])
        o = jax.nn.sigmoid(gates[3 * H:4 * H])
        c = f * c + i * g
        h = o * jnp.tanh(c)
        return (h, c), h

    (_, _), hs = lax.scan(step, (jnp.zeros(H), jnp.zeros(H)), emb)
    tag_space = jnp.dot(hs, params["w_out"].T, precision=_HI) + params["b_out"]
    return jax.nn.log_softmax(tag_space, axis=1)


def init_params(key, vocab_size, embedding_dim, hidden_dim, tagset_size):
    ks = jax.random.split(key, 7)
    s = 1.0 / jnp.sqrt(hidden_dim)
    return {
        "embedding": jax.random.normal(ks[0], (vocab_size, embedding_dim),
                                       jnp.float32),
        "w_ih": jax.random.uniform(ks[1], (4 * hidden_dim, embedding_dim),
                                   jnp.float32, -s, s),
        "w_hh": jax.random.uniform(ks[2], (4 * hidden_dim, hidden_dim),
                                   jnp.float32, -s, s),
        "b_ih": jax.random.uniform(ks[3], (4 * hidden_dim,), jnp.float32, -s, s),
        "b_hh": jax.random.uniform(ks[4], (4 * hidden_dim,), jnp.float32, -s, s),
        "w_out": jax.random.uniform(ks[5], (tagset_size, hidden_dim),
                                    jnp.float32, -s, s),
        "b_out": jax.random.uniform(ks[6], (tagset_size,), jnp.float32, -s, s),
    }


if __name__ == "__main__":
    EMBEDDING_DIM = 32
    HIDDEN_DIM = 32
    VOCAB_SIZE = 16
    TAGSET_SIZE = 8
    SEQ_LEN = 8
    BATCH = 2

    key = jax.random.PRNGKey(0)
    pkey, skey = jax.random.split(key)
    params = init_params(pkey, VOCAB_SIZE, EMBEDDING_DIM, HIDDEN_DIM,
                         TAGSET_SIZE)
    sentences = jax.random.randint(skey, (BATCH, SEQ_LEN), 0, VOCAB_SIZE,
                                   dtype=jnp.int32)

    # Batched path (one grid step per sentence, parallel across TCs).
    out = jax.block_until_ready(lstm_tagger_forward_batch(sentences, params))
    assert out.shape == (BATCH, SEQ_LEN, TAGSET_SIZE)

    ref = jnp.stack([_reference_forward(sentences[i], params)
                     for i in range(BATCH)])
    ref = jax.block_until_ready(ref)
    assert jnp.allclose(out, ref, atol=5e-5, rtol=5e-5), (
        "batched kernel mismatch: max abs err = "
        f"{jnp.max(jnp.abs(out - ref))}")

    # Single-sentence path (matches the PyTorch module API).
    out1 = jax.block_until_ready(lstm_tagger_forward(sentences[0], params))
    assert out1.shape == (SEQ_LEN, TAGSET_SIZE)
    assert jnp.allclose(out1, ref[0], atol=5e-5, rtol=5e-5)

    print("KERNEL_OK")
</pallas_src>

<mosaic_0001>
module attributes {stable_mosaic.version = 11 : i64} {
  func.func @_lstm_tagger_kernel(%arg0: i32, %arg1: memref<1x8x1xi32, #tpu.memory_space<vmem>>, %arg2: memref<16x32xf32, #tpu.memory_space<vmem>>, %arg3: memref<32x128xf32, #tpu.memory_space<vmem>>, %arg4: memref<32x128xf32, #tpu.memory_space<vmem>>, %arg5: memref<1x128xf32, #tpu.memory_space<vmem>>, %arg6: memref<32x128xf32, #tpu.memory_space<vmem>>, %arg7: memref<1x128xf32, #tpu.memory_space<vmem>>, %arg8: memref<1x8x128xf32, #tpu.memory_space<vmem>>) attributes {dimension_semantics = [#tpu.dimension_semantics<parallel>], iteration_bounds = array<i64: 2>, scalar_prefetch = 0 : i64, scratch_operands = 0 : i64, tpu.core_type = #tpu.core_type<tc>, window_params = [{transform_indices = @transform_0, window_bounds = array<i64: 1, 8, 1>}, {pipeline_mode = #tpu.pipeline_mode<synchronous>, transform_indices = @transform_1, window_bounds = array<i64: 16, 32>}, {pipeline_mode = #tpu.pipeline_mode<synchronous>, transform_indices = @transform_2, window_bounds = array<i64: 32, 128>}, {pipeline_mode = #tpu.pipeline_mode<synchronous>, transform_indices = @transform_3, window_bounds = array<i64: 32, 128>}, {pipeline_mode = #tpu.pipeline_mode<synchronous>, transform_indices = @transform_4, window_bounds = array<i64: 1, 128>}, {pipeline_mode = #tpu.pipeline_mode<synchronous>, transform_indices = @transform_5, window_bounds = array<i64: 32, 128>}, {pipeline_mode = #tpu.pipeline_mode<synchronous>, transform_indices = @transform_6, window_bounds = array<i64: 1, 128>}, {transform_indices = @transform_7, window_bounds = array<i64: 1, 8, 128>}]} {
    %c0 = arith.constant 0 : index
    %c0_0 = arith.constant 0 : index
    %c0_1 = arith.constant 0 : index
    %0 = vector.load %arg1[%c0, %c0_0, %c0_1] : memref<1x8x1xi32, #tpu.memory_space<vmem>>, vector<1x8x1xi32>
    %1 = vector.shape_cast %0 : vector<1x8x1xi32> to vector<8x1xi32>
    %2 = tpu.iota {dimensions = array<i32: 1>} : vector<8x16xi32>
    %3 = vector.broadcast %1 : vector<8x1xi32> to vector<8x16xi32>
    %4 = arith.cmpi eq, %3, %2 : vector<8x16xi32>
    %5 = arith.extui %4 : vector<8x16xi1> to vector<8x16xi32>
    %6 = arith.sitofp %5 : vector<8x16xi32> to vector<8x16xf32>
    %c0_2 = arith.constant 0 : index
    %c0_3 = arith.constant 0 : index
    %7 = vector.load %arg2[%c0_2, %c0_3] : memref<16x32xf32, #tpu.memory_space<vmem>>, vector<16x32xf32>
    %cst = arith.constant dense<0.000000e+00> : vector<8x32xf32>
    %8 = tpu.matmul %6, %7, %cst {dimension_numbers = #tpu.dot_dimension_numbers<[1], [0], [0], [1], [0, 0, 1, 1], [], []>, precision = #tpu.contract_precision<fp32>} : vector<8x16xf32>, vector<16x32xf32>, vector<8x32xf32> -> vector<8x32xf32>
    %c0_4 = arith.constant 0 : index
    %c0_5 = arith.constant 0 : index
    %9 = vector.load %arg3[%c0_4, %c0_5] : memref<32x128xf32, #tpu.memory_space<vmem>>, vector<32x128xf32>
    %cst_6 = arith.constant dense<0.000000e+00> : vector<8x128xf32>
    %10 = tpu.matmul %8, %9, %cst_6 {dimension_numbers = #tpu.dot_dimension_numbers<[1], [0], [0], [1], [0, 0, 1, 1], [], []>, precision = #tpu.contract_precision<fp32>} : vector<8x32xf32>, vector<32x128xf32>, vector<8x128xf32> -> vector<8x128xf32>
    %c0_7 = arith.constant 0 : index
    %c0_8 = arith.constant 0 : index
    %11 = vector.load %arg5[%c0_7, %c0_8] : memref<1x128xf32, #tpu.memory_space<vmem>>, vector<1x128xf32>
    %12 = vector.broadcast %11 : vector<1x128xf32> to vector<8x128xf32>
    %13 = arith.addf %10, %12 : vector<8x128xf32>
    %c0_9 = arith.constant 0 : index
    %c0_10 = arith.constant 0 : index
    %14 = vector.load %arg4[%c0_9, %c0_10] : memref<32x128xf32, #tpu.memory_space<vmem>>, vector<32x128xf32>
    %15 = tpu.iota {dimensions = array<i32: 1>} : vector<1x128xi32>
    %c64_i32 = arith.constant 64 : i32
    %16 = vector.broadcast %c64_i32 : i32 to vector<1x128xi32>
    %17 = arith.cmpi sge, %15, %16 : vector<1x128xi32>
    %c96_i32 = arith.constant 96 : i32
    %18 = vector.broadcast %c96_i32 : i32 to vector<1x128xi32>
    %19 = arith.cmpi slt, %15, %18 : vector<1x128xi32>
    %20 = arith.andi %17, %19 : vector<1x128xi1>
    %cst_11 = arith.constant 1.000000e+00 : f32
    %cst_12 = arith.constant 5.000000e-01 : f32
    %21 = vector.broadcast %cst_11 : f32 to vector<1x128xf32>
    %22 = vector.broadcast %cst_12 : f32 to vector<1x128xf32>
    %23 = arith.select %20, %21, %22 : vector<1x128xi1>, vector<1x128xf32>
    %cst_13 = arith.constant 0.000000e+00 : f32
    %24 = vector.broadcast %cst_13 : f32 to vector<1x32xf32>
    %cst_14 = arith.constant 0.000000e+00 : f32
    %25 = vector.broadcast %cst_14 : f32 to vector<1x32xf32>
    %26 = vector.extract_strided_slice %13 {offsets = [0, 0], sizes = [1, 128], strides = [1, 1]} : vector<8x128xf32> to vector<1x128xf32>
    %cst_15 = arith.constant dense<0.000000e+00> : vector<1x128xf32>
    %27 = tpu.matmul %24, %14, %cst_15 {dimension_numbers = #tpu.dot_dimension_numbers<[1], [0], [0], [1], [0, 0, 1, 1], [], []>, precision = #tpu.contract_precision<fp32>} : vector<1x32xf32>, vector<32x128xf32>, vector<1x128xf32> -> vector<1x128xf32>
    %28 = arith.addf %26, %27 : vector<1x128xf32>
    %29 = arith.mulf %28, %23 : vector<1x128xf32>
    %30 = math.tanh %29 : vector<1x128xf32>
    %cst_16 = arith.constant 5.000000e-01 : f32
    %31 = vector.broadcast %cst_16 : f32 to vector<1x128xf32>
    %32 = arith.mulf %31, %30 : vector<1x128xf32>
    %cst_17 = arith.constant 5.000000e-01 : f32
    %33 = vector.broadcast %cst_17 : f32 to vector<1x128xf32>
    %34 = arith.addf %32, %33 : vector<1x128xf32>
    %35 = arith.select %20, %30, %34 : vector<1x128xi1>, vector<1x128xf32>
    %36 = vector.extract_strided_slice %35 {offsets = [0, 0], sizes = [1, 32], strides = [1, 1]} : vector<1x128xf32> to vector<1x32xf32>
    %37 = vector.extract_strided_slice %35 {offsets = [0, 32], sizes = [1, 32], strides = [1, 1]} : vector<1x128xf32> to vector<1x32xf32>
    %38 = vector.extract_strided_slice %35 {offsets = [0, 64], sizes = [1, 32], strides = [1, 1]} : vector<1x128xf32> to vector<1x32xf32>
    %39 = vector.extract_strided_slice %35 {offsets = [0, 96], sizes = [1, 32], strides = [1, 1]} : vector<1x128xf32> to vector<1x32xf32>
    %40 = arith.mulf %37, %25 : vector<1x32xf32>
    %41 = arith.mulf %36, %38 : vector<1x32xf32>
    %42 = arith.addf %40, %41 : vector<1x32xf32>
    %43 = math.tanh %42 : vector<1x32xf32>
    %44 = arith.mulf %39, %43 : vector<1x32xf32>
    %45 = vector.extract_strided_slice %13 {offsets = [1, 0], sizes = [1, 128], strides = [1, 1]} : vector<8x128xf32> to vector<1x128xf32>
    %cst_18 = arith.constant dense<0.000000e+00> : vector<1x128xf32>
    %46 = tpu.matmul %44, %14, %cst_18 {dimension_numbers = #tpu.dot_dimension_numbers<[1], [0], [0], [1], [0, 0, 1, 1], [], []>, precision = #tpu.contract_precision<fp32>} : vector<1x32xf32>, vector<32x128xf32>, vector<1x128xf32> -> vector<1x128xf32>
    %47 = arith.addf %45, %46 : vector<1x128xf32>
    %48 = arith.mulf %47, %23 : vector<1x128xf32>
    %49 = math.tanh %48 : vector<1x128xf32>
    %cst_19 = arith.constant 5.000000e-01 : f32
    %50 = vector.broadcast %cst_19 : f32 to vector<1x128xf32>
    %51 = arith.mulf %50, %49 : vector<1x128xf32>
    %cst_20 = arith.constant 5.000000e-01 : f32
    %52 = vector.broadcast %cst_20 : f32 to vector<1x128xf32>
    %53 = arith.addf %51, %52 : vector<1x128xf32>
    %54 = arith.select %20, %49, %53 : vector<1x128xi1>, vector<1x128xf32>
    %55 = vector.extract_strided_slice %54 {offsets = [0, 0], sizes = [1, 32], strides = [1, 1]} : vector<1x128xf32> to vector<1x32xf32>
    %56 = vector.extract_strided_slice %54 {offsets = [0, 32], sizes = [1, 32], strides = [1, 1]} : vector<1x128xf32> to vector<1x32xf32>
    %57 = vector.extract_strided_slice %54 {offsets = [0, 64], sizes = [1, 32], strides = [1, 1]} : vector<1x128xf32> to vector<1x32xf32>
    %58 = vector.extract_strided_slice %54 {offsets = [0, 96], sizes = [1, 32], strides = [1, 1]} : vector<1x128xf32> to vector<1x32xf32>
    %59 = arith.mulf %56, %42 : vector<1x32xf32>
    %60 = arith.mulf %55, %57 : vector<1x32xf32>
    %61 = arith.addf %59, %60 : vector<1x32xf32>
    %62 = math.tanh %61 : vector<1x32xf32>
    %63 = arith.mulf %58, %62 : vector<1x32xf32>
    %64 = vector.extract_strided_slice %13 {offsets = [2, 0], sizes = [1, 128], strides = [1, 1]} : vector<8x128xf32> to vector<1x128xf32>
    %cst_21 = arith.constant dense<0.000000e+00> : vector<1x128xf32>
    %65 = tpu.matmul %63, %14, %cst_21 {dimension_numbers = #tpu.dot_dimension_numbers<[1], [0], [0], [1], [0, 0, 1, 1], [], []>, precision = #tpu.contract_precision<fp32>} : vector<1x32xf32>, vector<32x128xf32>, vector<1x128xf32> -> vector<1x128xf32>
    %66 = arith.addf %64, %65 : vector<1x128xf32>
    %67 = arith.mulf %66, %23 : vector<1x128xf32>
    %68 = math.tanh %67 : vector<1x128xf32>
    %cst_22 = arith.constant 5.000000e-01 : f32
    %69 = vector.broadcast %cst_22 : f32 to vector<1x128xf32>
    %70 = arith.mulf %69, %68 : vector<1x128xf32>
    %cst_23 = arith.constant 5.000000e-01 : f32
    %71 = vector.broadcast %cst_23 : f32 to vector<1x128xf32>
    %72 = arith.addf %70, %71 : vector<1x128xf32>
    %73 = arith.select %20, %68, %72 : vector<1x128xi1>, vector<1x128xf32>
    %74 = vector.extract_strided_slice %73 {offsets = [0, 0], sizes = [1, 32], strides = [1, 1]} : vector<1x128xf32> to vector<1x32xf32>
    %75 = vector.extract_strided_slice %73 {offsets = [0, 32], sizes = [1, 32], strides = [1, 1]} : vector<1x128xf32> to vector<1x32xf32>
    %76 = vector.extract_strided_slice %73 {offsets = [0, 64], sizes = [1, 32], strides = [1, 1]} : vector<1x128xf32> to vector<1x32xf32>
    %77 = vector.extract_strided_slice %73 {offsets = [0, 96], sizes = [1, 32], strides = [1, 1]} : vector<1x128xf32> to vector<1x32xf32>
    %78 = arith.mulf %75, %61 : vector<1x32xf32>
    %79 = arith.mulf %74, %76 : vector<1x32xf32>
    %80 = arith.addf %78, %79 : vector<1x32xf32>
    %81 = math.tanh %80 : vector<1x32xf32>
    %82 = arith.mulf %77, %81 : vector<1x32xf32>
    %83 = vector.extract_strided_slice %13 {offsets = [3, 0], sizes = [1, 128], strides = [1, 1]} : vector<8x128xf32> to vector<1x128xf32>
    %cst_24 = arith.constant dense<0.000000e+00> : vector<1x128xf32>
    %84 = tpu.matmul %82, %14, %cst_24 {dimension_numbers = #tpu.dot_dimension_numbers<[1], [0], [0], [1], [0, 0, 1, 1], [], []>, precision = #tpu.contract_precision<fp32>} : vector<1x32xf32>, vector<32x128xf32>, vector<1x128xf32> -> vector<1x128xf32>
    %85 = arith.addf %83, %84 : vector<1x128xf32>
    %86 = arith.mulf %85, %23 : vector<1x128xf32>
    %87 = math.tanh %86 : vector<1x128xf32>
    %cst_25 = arith.constant 5.000000e-01 : f32
    %88 = vector.broadcast %cst_25 : f32 to vector<1x128xf32>
    %89 = arith.mulf %88, %87 : vector<1x128xf32>
    %cst_26 = arith.constant 5.000000e-01 : f32
    %90 = vector.broadcast %cst_26 : f32 to vector<1x128xf32>
    %91 = arith.addf %89, %90 : vector<1x128xf32>
    %92 = arith.select %20, %87, %91 : vector<1x128xi1>, vector<1x128xf32>
    %93 = vector.extract_strided_slice %92 {offsets = [0, 0], sizes = [1, 32], strides = [1, 1]} : vector<1x128xf32> to vector<1x32xf32>
    %94 = vector.extract_strided_slice %92 {offsets = [0, 32], sizes = [1, 32], strides = [1, 1]} : vector<1x128xf32> to vector<1x32xf32>
    %95 = vector.extract_strided_slice %92 {offsets = [0, 64], sizes = [1, 32], strides = [1, 1]} : vector<1x128xf32> to vector<1x32xf32>
    %96 = vector.extract_strided_slice %92 {offsets = [0, 96], sizes = [1, 32], strides = [1, 1]} : vector<1x128xf32> to vector<1x32xf32>
    %97 = arith.mulf %94, %80 : vector<1x32xf32>
    %98 = arith.mulf %93, %95 : vector<1x32xf32>
    %99 = arith.addf %97, %98 : vector<1x32xf32>
    %100 = math.tanh %99 : vector<1x32xf32>
    %101 = arith.mulf %96, %100 : vector<1x32xf32>
    %102 = vector.extract_strided_slice %13 {offsets = [4, 0], sizes = [1, 128], strides = [1, 1]} : vector<8x128xf32> to vector<1x128xf32>
    %cst_27 = arith.constant dense<0.000000e+00> : vector<1x128xf32>
    %103 = tpu.matmul %101, %14, %cst_27 {dimension_numbers = #tpu.dot_dimension_numbers<[1], [0], [0], [1], [0, 0, 1, 1], [], []>, precision = #tpu.contract_precision<fp32>} : vector<1x32xf32>, vector<32x128xf32>, vector<1x128xf32> -> vector<1x128xf32>
    %104 = arith.addf %102, %103 : vector<1x128xf32>
    %105 = arith.mulf %104, %23 : vector<1x128xf32>
    %106 = math.tanh %105 : vector<1x128xf32>
    %cst_28 = arith.constant 5.000000e-01 : f32
    %107 = vector.broadcast %cst_28 : f32 to vector<1x128xf32>
    %108 = arith.mulf %107, %106 : vector<1x128xf32>
    %cst_29 = arith.constant 5.000000e-01 : f32
    %109 = vector.broadcast %cst_29 : f32 to vector<1x128xf32>
    %110 = arith.addf %108, %109 : vector<1x128xf32>
    %111 = arith.select %20, %106, %110 : vector<1x128xi1>, vector<1x128xf32>
    %112 = vector.extract_strided_slice %111 {offsets = [0, 0], sizes = [1, 32], strides = [1, 1]} : vector<1x128xf32> to vector<1x32xf32>
    %113 = vector.extract_strided_slice %111 {offsets = [0, 32], sizes = [1, 32], strides = [1, 1]} : vector<1x128xf32> to vector<1x32xf32>
    %114 = vector.extract_strided_slice %111 {offsets = [0, 64], sizes = [1, 32], strides = [1, 1]} : vector<1x128xf32> to vector<1x32xf32>
    %115 = vector.extract_strided_slice %111 {offsets = [0, 96], sizes = [1, 32], strides = [1, 1]} : vector<1x128xf32> to vector<1x32xf32>
    %116 = arith.mulf %113, %99 : vector<1x32xf32>
    %117 = arith.mulf %112, %114 : vector<1x32xf32>
    %118 = arith.addf %116, %117 : vector<1x32xf32>
    %119 = math.tanh %118 : vector<1x32xf32>
    %120 = arith.mulf %115, %119 : vector<1x32xf32>
    %121 = vector.extract_strided_slice %13 {offsets = [5, 0], sizes = [1, 128], strides = [1, 1]} : vector<8x128xf32> to vector<1x128xf32>
    %cst_30 = arith.constant dense<0.000000e+00> : vector<1x128xf32>
    %122 = tpu.matmul %120, %14, %cst_30 {dimension_numbers = #tpu.dot_dimension_numbers<[1], [0], [0], [1], [0, 0, 1, 1], [], []>, precision = #tpu.contract_precision<fp32>} : vector<1x32xf32>, vector<32x128xf32>, vector<1x128xf32> -> vector<1x128xf32>
    %123 = arith.addf %121, %122 : vector<1x128xf32>
    %124 = arith.mulf %123, %23 : vector<1x128xf32>
    %125 = math.tanh %124 : vector<1x128xf32>
    %cst_31 = arith.constant 5.000000e-01 : f32
    %126 = vector.broadcast %cst_31 : f32 to vector<1x128xf32>
    %127 = arith.mulf %126, %125 : vector<1x128xf32>
    %cst_32 = arith.constant 5.000000e-01 : f32
    %128 = vector.broadcast %cst_32 : f32 to vector<1x128xf32>
    %129 = arith.addf %127, %128 : vector<1x128xf32>
    %130 = arith.select %20, %125, %129 : vector<1x128xi1>, vector<1x128xf32>
    %131 = vector.extract_strided_slice %130 {offsets = [0, 0], sizes = [1, 32], strides = [1, 1]} : vector<1x128xf32> to vector<1x32xf32>
    %132 = vector.extract_strided_slice %130 {offsets = [0, 32], sizes = [1, 32], strides = [1, 1]} : vector<1x128xf32> to vector<1x32xf32>
    %133 = vector.extract_strided_slice %130 {offsets = [0, 64], sizes = [1, 32], strides = [1, 1]} : vector<1x128xf32> to vector<1x32xf32>
    %134 = vector.extract_strided_slice %130 {offsets = [0, 96], sizes = [1, 32], strides = [1, 1]} : vector<1x128xf32> to vector<1x32xf32>
    %135 = arith.mulf %132, %118 : vector<1x32xf32>
    %136 = arith.mulf %131, %133 : vector<1x32xf32>
    %137 = arith.addf %135, %136 : vector<1x32xf32>
    %138 = math.tanh %137 : vector<1x32xf32>
    %139 = arith.mulf %134, %138 : vector<1x32xf32>
    %140 = vector.extract_strided_slice %13 {offsets = [6, 0], sizes = [1, 128], strides = [1, 1]} : vector<8x128xf32> to vector<1x128xf32>
    %cst_33 = arith.constant dense<0.000000e+00> : vector<1x128xf32>
    %141 = tpu.matmul %139, %14, %cst_33 {dimension_numbers = #tpu.dot_dimension_numbers<[1], [0], [0], [1], [0, 0, 1, 1], [], []>, precision = #tpu.contract_precision<fp32>} : vector<1x32xf32>, vector<32x128xf32>, vector<1x128xf32> -> vector<1x128xf32>
    %142 = arith.addf %140, %141 : vector<1x128xf32>
    %143 = arith.mulf %142, %23 : vector<1x128xf32>
    %144 = math.tanh %143 : vector<1x128xf32>
    %cst_34 = arith.constant 5.000000e-01 : f32
    %145 = vector.broadcast %cst_34 : f32 to vector<1x128xf32>
    %146 = arith.mulf %145, %144 : vector<1x128xf32>
    %cst_35 = arith.constant 5.000000e-01 : f32
    %147 = vector.broadcast %cst_35 : f32 to vector<1x128xf32>
    %148 = arith.addf %146, %147 : vector<1x128xf32>
    %149 = arith.select %20, %144, %148 : vector<1x128xi1>, vector<1x128xf32>
    %150 = vector.extract_strided_slice %149 {offsets = [0, 0], sizes = [1, 32], strides = [1, 1]} : vector<1x128xf32> to vector<1x32xf32>
    %151 = vector.extract_strided_slice %149 {offsets = [0, 32], sizes = [1, 32], strides = [1, 1]} : vector<1x128xf32> to vector<1x32xf32>
    %152 = vector.extract_strided_slice %149 {offsets = [0, 64], sizes = [1, 32], strides = [1, 1]} : vector<1x128xf32> to vector<1x32xf32>
    %153 = vector.extract_strided_slice %149 {offsets = [0, 96], sizes = [1, 32], strides = [1, 1]} : vector<1x128xf32> to vector<1x32xf32>
    %154 = arith.mulf %151, %137 : vector<1x32xf32>
    %155 = arith.mulf %150, %152 : vector<1x32xf32>
    %156 = arith.addf %154, %155 : vector<1x32xf32>
    %157 = math.tanh %156 : vector<1x32xf32>
    %158 = arith.mulf %153, %157 : vector<1x32xf32>
    %159 = vector.extract_strided_slice %13 {offsets = [7, 0], sizes = [1, 128], strides = [1, 1]} : vector<8x128xf32> to vector<1x128xf32>
    %cst_36 = arith.constant dense<0.000000e+00> : vector<1x128xf32>
    %160 = tpu.matmul %158, %14, %cst_36 {dimension_numbers = #tpu.dot_dimension_numbers<[1], [0], [0], [1], [0, 0, 1, 1], [], []>, precision = #tpu.contract_precision<fp32>} : vector<1x32xf32>, vector<32x128xf32>, vector<1x128xf32> -> vector<1x128xf32>
    %161 = arith.addf %159, %160 : vector<1x128xf32>
    %162 = arith.mulf %161, %23 : vector<1x128xf32>
    %163 = math.tanh %162 : vector<1x128xf32>
    %cst_37 = arith.constant 5.000000e-01 : f32
    %164 = vector.broadcast %cst_37 : f32 to vector<1x128xf32>
    %165 = arith.mulf %164, %163 : vector<1x128xf32>
    %cst_38 = arith.constant 5.000000e-01 : f32
    %166 = vector.broadcast %cst_38 : f32 to vector<1x128xf32>
    %167 = arith.addf %165, %166 : vector<1x128xf32>
    %168 = arith.select %20, %163, %167 : vector<1x128xi1>, vector<1x128xf32>
    %169 = vector.extract_strided_slice %168 {offsets = [0, 0], sizes = [1, 32], strides = [1, 1]} : vector<1x128xf32> to vector<1x32xf32>
    %170 = vector.extract_strided_slice %168 {offsets = [0, 32], sizes = [1, 32], strides = [1, 1]} : vector<1x128xf32> to vector<1x32xf32>
    %171 = vector.extract_strided_slice %168 {offsets = [0, 64], sizes = [1, 32], strides = [1, 1]} : vector<1x128xf32> to vector<1x32xf32>
    %172 = vector.extract_strided_slice %168 {offsets = [0, 96], sizes = [1, 32], strides = [1, 1]} : vector<1x128xf32> to vector<1x32xf32>
    %173 = arith.mulf %170, %156 : vector<1x32xf32>
    %174 = arith.mulf %169, %171 : vector<1x32xf32>
    %175 = arith.addf %173, %174 : vector<1x32xf32>
    %176 = math.tanh %175 : vector<1x32xf32>
    %177 = arith.mulf %172, %176 : vector<1x32xf32>
    %178 = tpu.concatenate %44, %63, %82, %101, %120, %139, %158, %177 in 0 : vector<1x32xf32>, vector<1x32xf32>, vector<1x32xf32>, vector<1x32xf32>, vector<1x32xf32>, vector<1x32xf32>, vector<1x32xf32>, vector<1x32xf32> -> vector<8x32xf32>
    %c0_39 = arith.constant 0 : index
    %c0_40 = arith.constant 0 : index
    %179 = vector.load %arg6[%c0_39, %c0_40] : memref<32x128xf32, #tpu.memory_space<vmem>>, vector<32x128xf32>
    %cst_41 = arith.constant dense<0.000000e+00> : vector<8x128xf32>
    %180 = tpu.matmul %178, %179, %cst_41 {dimension_numbers = #tpu.dot_dimension_numbers<[1], [0], [0], [1], [0, 0, 1, 1], [], []>, precision = #tpu.contract_precision<fp32>} : vector<8x32xf32>, vector<32x128xf32>, vector<8x128xf32> -> vector<8x128xf32>
    %c0_42 = arith.constant 0 : index
    %c0_43 = arith.constant 0 : index
    %181 = vector.load %arg7[%c0_42, %c0_43] : memref<1x128xf32, #tpu.memory_space<vmem>>, vector<1x128xf32>
    %182 = vector.broadcast %181 : vector<1x128xf32> to vector<8x128xf32>
    %183 = arith.addf %180, %182 : vector<8x128xf32>
    %cst_44 = arith.constant dense<0xFF800000> : vector<8xf32>
    %184 = vector.multi_reduction <maximumf>, %183, %cst_44 [1] : vector<8x128xf32> to vector<8xf32>
    %185 = vector.shape_cast %184 : vector<8xf32> to vector<8x1xf32>
    %186 = vector.broadcast %185 : vector<8x1xf32> to vector<8x128xf32>
    %187 = arith.subf %183, %186 : vector<8x128xf32>
    %188 = math.exp %187 : vector<8x128xf32>
    %cst_45 = arith.constant dense<0.000000e+00> : vector<8xf32>
    %189 = vector.multi_reduction <add>, %188, %cst_45 [1] : vector<8x128xf32> to vector<8xf32>
    %190 = vector.shape_cast %189 : vector<8xf32> to vector<8x1xf32>
    %191 = math.log %190 : vector<8x1xf32>
    %192 = vector.broadcast %191 : vector<8x1xf32> to vector<8x128xf32>
    %193 = arith.subf %187, %192 : vector<8x128xf32>
    %c0_46 = arith.constant 0 : index
    %c0_47 = arith.constant 0 : index
    %c0_48 = arith.constant 0 : index
    %194 = vector.load %arg8[%c0_46, %c0_47, %c0_48] : memref<1x8x128xf32, #tpu.memory_space<vmem>>, vector<1x8x128xf32>
    %195 = vector.shape_cast %194 : vector<1x8x128xf32> to vector<8x128xf32>
    %196 = vector.shape_cast %193 : vector<8x128xf32> to vector<1x8x128xf32>
    tpu.vector_store %arg8[%c0_46, %c0_47, %c0_48], %196 {strides = array<i32>} : memref<1x8x128xf32, #tpu.memory_space<vmem>>, vector<1x8x128xf32>,
    return
  }
  func.func @transform_0(%arg0: i32) -> (i32, i32, i32) {
    %c0_i32 = arith.constant 0 : i32
    %c0_i32_0 = arith.constant 0 : i32
    %c0_i32_1 = arith.constant 0 : i32
    return %arg0, %c0_i32, %c0_i32_0 : i32, i32, i32
  }
  func.func @transform_1(%arg0: i32) -> (i32, i32) {
    %c0_i32 = arith.constant 0 : i32
    %c0_i32_0 = arith.constant 0 : i32
    %c0_i32_1 = arith.constant 0 : i32
    return %c0_i32, %c0_i32_0 : i32, i32
  }
  func.func @transform_2(%arg0: i32) -> (i32, i32) {
    %c0_i32 = arith.constant 0 : i32
    %c0_i32_0 = arith.constant 0 : i32
    %c0_i32_1 = arith.constant 0 : i32
    return %c0_i32, %c0_i32_0 : i32, i32
  }
  func.func @transform_3(%arg0: i32) -> (i32, i32) {
    %c0_i32 = arith.constant 0 : i32
    %c0_i32_0 = arith.constant 0 : i32
    %c0_i32_1 = arith.constant 0 : i32
    return %c0_i32, %c0_i32_0 : i32, i32
  }
  func.func @transform_4(%arg0: i32) -> (i32, i32) {
    %c0_i32 = arith.constant 0 : i32
    %c0_i32_0 = arith.constant 0 : i32
    %c0_i32_1 = arith.constant 0 : i32
    return %c0_i32, %c0_i32_0 : i32, i32
  }
  func.func @transform_5(%arg0: i32) -> (i32, i32) {
    %c0_i32 = arith.constant 0 : i32
    %c0_i32_0 = arith.constant 0 : i32
    %c0_i32_1 = arith.constant 0 : i32
    return %c0_i32, %c0_i32_0 : i32, i32
  }
  func.func @transform_6(%arg0: i32) -> (i32, i32) {
    %c0_i32 = arith.constant 0 : i32
    %c0_i32_0 = arith.constant 0 : i32
    %c0_i32_1 = arith.constant 0 : i32
    return %c0_i32, %c0_i32_0 : i32, i32
  }
  func.func @transform_7(%arg0: i32) -> (i32, i32, i32) {
    %c0_i32 = arith.constant 0 : i32
    %c0_i32_0 = arith.constant 0 : i32
    %c0_i32_1 = arith.constant 0 : i32
    return %arg0, %c0_i32, %c0_i32_0 : i32, i32, i32
  }
}

</mosaic_0001>

<bundles_post_ra>
// kernel: lstm_tagger_forward_batch.1
= control target key start
LH: loop header
LB: loop body
LE: loop exit
PB: predicated region body
PF: predicated region fallthrough
CT: control target
= control target key end

     0   :  { %12 = vsyncpa [#allocation3], 0  ;;  %s8436_s0 = inlined_call_operand.vmem [shape: s32[2,8,1], index: 0, kind: input, shape index: {}]   ;;  %s8437_s1 = inlined_call_operand.vmem [shape: f32[16,32], index: 1, kind: input, shape index: {}]   ;;  %s8438_s2 = inlined_call_operand.vmem [shape: f32[32,128], index: 2, kind: input, shape index: {}]   ;;  %s8439_s3 = inlined_call_operand.vmem [shape: f32[32,128], index: 3, kind: input, shape index: {}]   ;;  %s8440_s4 = inlined_call_operand.vmem [shape: f32[1,128], index: 4, kind: input, shape index: {}]   ;;  %s8441_s5 = inlined_call_operand.vmem [shape: f32[32,128], index: 5, kind: input, shape index: {}]   ;;  %s8442_s6 = inlined_call_operand.vmem [shape: f32[1,128], index: 6, kind: input, shape index: {}]   ;;  %s8443_s7 = inlined_call_operand.hbm [shape: f32[2,8,128], index: 7, kind: output, shape index: {}]  }
   0x1   :  { %14 = vsyncpa [#allocation3 + $0x1], 0  ;;  %s7715_s24 = smov 0   ;;  %s7717_s25 = smov 0  }
   0x2   :  { %s7719_s26 = smov 0   ;;  %s7721_s27 = smov 0  }
   0x3 LB: > { %s7736_s28 = sadd.s32 4294967295, %s7665_s27   ;;  %s6005_s29 = sadd.s32 4294967294, %s7665_s27   ;;  %s7665_s27 = sphi %s7721_s27, %s8451_s27   ;;  %s7661_s26 = sphi %s7719_s26, %s8450_s26   ;;  %s7657_s25 = sphi %s7717_s25, %s8449_s25   ;;  %s7653_s24 = sphi %s7715_s24, %s8448_s24  }
   0x4   : > { %s7740_s30 = sadd.s32 1, %s7665_s27   ;;  %s179_s8 = sadd.s32 1, %s7661_s26 }
   0x5   : > { %s176_s9 = ssub.s32 %s7665_s27, %s7740_s30  ;;  %p189_p0 = scmp.ne.s32.totalorder %s7661_s26, %s7657_s25 }
   0x6   : > { %p177_p1 = scmp.eq.s32.totalorder %s176_s9, 0  ;;  %p190_p2 = scmp.eq.s32.totalorder %s7736_s28, 1 }
   0x7   : > { %p195_p3 = scmp.ne.s32.totalorder %s7657_s25, %s7653_s24  ;;  %p196_p4 = scmp.eq.s32.totalorder %s6005_s29, 1 }
   0x8   : > { %s7751_s10 = scalar_select %p177_p1, %s7661_s26, %s179_s8  }
   0x9   : > { %p7753_p5 = por %p190_p2, %p189_p0  ;;  %p7757_p6 = por %p196_p4, %p195_p3 }
   0xa   : > { %p6008_p7 = scmp.ge.s32.totalorder %s7665_s27, 1  ;;  %p239_p8 = scmp.lt.s32.totalorder %s7665_s27, 3 }
   0xc   : > { %p240_p9 = pnand %p6008_p7, %p239_p8 }
   0xd   : > { %p270_p10 = scmp.lt.s32.totalorder (!%p240_p9), %s7736_s28, 1  ;;  %v283_v0 = vld [vmem:[%s8437_s1] sm:$0xff] (!%p240_p9)  ;;  %v284_v1 = vld [vmem:[%s8437_s1 + $0x8] sm:$0xff] (!%p240_p9)  ;;  %v7667_v2 = vmov (!%p240_p9), 0   ;;  %v7668_v3 = vmov (!%p240_p9), 0.0|0.0   ;;  %vm7669_vm0 = vmmov (!%p240_p9), 0   ;;  %v275_v20 = vlaneseq (!%p240_p9) }
   0xe   : > { %243 = sbr.rel (%p240_p9) target bundleno = 7114 (0x1bca), region = 48  ;;  %7566 = vset.pattern.permute.xlu0 (!%p240_p9), %v7667_v2  ;;  %7044 = vmatprep.subr.bf16.mxu0 (!%p240_p9), %v7668_v3  ;;  %v290_v4 = vand.u32 (!%p240_p9), 4294901760, %v283_v0  ;;  %v293_v5 = vand.u32 (!%p240_p9), 4294901760, %v284_v1  ;;  %v7670_v13 = vmov (!%p240_p9), 0.0   ;;  %vm285_vm1 = vcmask (!%p240_p9), 130048   ;;  %v1248_v29 = vld [vmem:[%s8439_s3] sm:$0xff] (!%p240_p9) }
   0xf   : > { %7041 = vmatprep.subr.bf16.mxu1 (!%p240_p9), %v7668_v3  ;;  %6350 = vmatprep.mubr.msk.f32.mxu0 (!%p240_p9), %vm7669_vm0, %v7670_v13  ;;  %v7782_v21 = vand.u32 (!%p240_p9), 127, %v275_v20  ;;  %v1249_v30 = vld [vmem:[%s8439_s3 + $0x8] sm:$0xff] (!%p240_p9)  ;;  %v1260_v31 = vand.u32 (!%p240_p9), 4294901760, %v1248_v29  ;;  %v748_v33 = vld [vmem:[%s8438_s2] sm:$0xff] (!%p240_p9)  ;;  %v1250_v43 = vld [vmem:[%s8439_s3 + $0x10] sm:$0xff] (!%p240_p9)  ;;  %vm759_vm3 = vcmask (!%p240_p9), 261120  }
  0x10   : > { %v368_v6 = vsub.f32 (!%p240_p9), %v283_v0, %v290_v4  ;;  %v375_v7 = vsub.f32 (!%p240_p9), %v284_v1, %v293_v5  ;;  %6343 = vmatprep.mubr.msk.f32.mxu1 (!%p240_p9), %vm7669_vm0, %v7670_v13  ;;  %v7042_v17 = vpack.c.bf16 (!%p240_p9), %v293_v5, %v290_v4  ;;  %v1263_v32 = vand.u32 (!%p240_p9), 4294901760, %v1249_v30  ;;  %v749_v34 = vld [vmem:[%s8438_s2 + $0x8] sm:$0xff] (!%p240_p9)  ;;  %v1251_v44 = vld [vmem:[%s8439_s3 + $0x18] sm:$0xff] (!%p240_p9)  ;;  %v750_v47 = vld [vmem:[%s8438_s2 + $0x10] sm:$0xff] (!%p240_p9)  ;;  %s7672_s9 = smov (!%p240_p9), 64   ;;  %s7673_s13 = smov (!%p240_p9), 32  }
  0x11   : > { %v764_v35 = vand.u32 (!%p240_p9), 4294901760, %v748_v33  ;;  %v767_v36 = vand.u32 (!%p240_p9), 4294901760, %v749_v34  ;;  %v7820_v38 = vsub.f32 (!%p240_p9), %v1248_v29, %v1260_v31  ;;  %v1266_v45 = vand.u32 (!%p240_p9), 4294901760, %v1250_v43  ;;  %v751_v48 = vld [vmem:[%s8438_s2 + $0x18] sm:$0xff] (!%p240_p9)  ;;  %s267_s29 = sand.u32 (!%p240_p9), 1, %s7657_s25  }
  0x12   : > { %v369_v8 = vand.u32 (!%p240_p9), 4294901760, %v368_v6  ;;  %v376_v9 = vand.u32 (!%p240_p9), 4294901760, %v375_v7  ;;  %v7048_v16 = vpack.c.bf16 (!%p240_p9), %v375_v7, %v368_v6  ;;  %7043 = vmatpush3.bf16.msra.mxu1 (!%p240_p9), %v7042_v17  ;;  %v7818_v37 = vpack.c.bf16 (!%p240_p9), %v1263_v32, %v1260_v31  ;;  %s6009_s8 = sshll.u32 (!%p240_p9), %s267_s29, 3 }
  0x13   : > { %7059 = vmatprep.subr.bf16.mxu1 (!%p240_p9), %v7668_v3  ;;  %v7822_v39 = vsub.f32 (!%p240_p9), %v1249_v30, %v1263_v32  ;;  %v7824_v40 = vpack.c.bf16 (!%p240_p9), %v767_v36, %v764_v35  ;;  %v7826_v41 = vsub.f32 (!%p240_p9), %v748_v33, %v764_v35  ;;  %v7828_v42 = vsub.f32 (!%p240_p9), %v749_v34, %v767_v36 }
  0x14   : > { %v370_v11 = vsub.f32 (!%p240_p9), %v368_v6, %v369_v8  ;;  %v377_v12 = vsub.f32 (!%p240_p9), %v375_v7, %v376_v9  ;;  %v7054_v19 = vpack.c.bf16 (!%p240_p9), %v376_v9, %v369_v8  ;;  %v1269_v46 = vand.u32 (!%p240_p9), 4294901760, %v1251_v44 }
  0x15   : > { %s271_s17 = scalar_select %p270_p10, %s7736_s28, 1  ;;  %v1341_v49 = vand.u32 4294901760, %v7820_v38  ;;  %v1348_v50 = vand.u32 4294901760, %v7822_v39  ;;  %v770_v51 = vand.u32 4294901760, %v750_v47  ;;  %v773_v52 = vand.u32 4294901760, %v751_v48 }
  0x16   : > { %v371_v14 = vand.u32 4294901760, %v370_v11  ;;  %v378_v15 = vand.u32 4294901760, %v377_v12  ;;  %v845_v53 = vand.u32 4294901760, %v7826_v41  ;;  %v852_v54 = vand.u32 4294901760, %v7828_v42 }
  0x17   : > { %s6010_s18 = sshll.u32 %s271_s17, 3  ;;  %v7850_v55 = vpack.c.bf16 %v1269_v46, %v1266_v45  ;;  %v1342_v56 = vsub.f32 %v7820_v38, %v1341_v49  ;;  %v1349_v57 = vsub.f32 %v7822_v39, %v1348_v50  ;;  %v7858_v58 = vpack.c.bf16 %v773_v52, %v770_v51 }
  0x18   : > { %s273_s21 = scalar_lea.vmem %s8436_s0, %s6010_s18  ;;  %v7045_v18 = vpack.c.bf16 %v378_v15, %v371_v14  ;;  %v7860_v59 = vsub.f32 %v750_v47, %v770_v51  ;;  %v7862_v60 = vsub.f32 %v751_v48, %v773_v52  ;;  %v846_v61 = vsub.f32 %v7826_v41, %v845_v53  ;;  %s5933_s18 = scalar_lea.sflag [#allocation3], %s267_s29 }
  0x19   : > { %v274_v10 = vld [vmem:[%s273_s21] sm:$0xff]  ;;  %v1343_v62 = vand.u32 4294901760, %v1342_v56  ;;  %v1350_v63 = vand.u32 4294901760, %v1349_v57  ;;  %v853_v0 = vsub.f32 %v7828_v42, %v852_v54  ;;  %v1354_v1 = vsub.f32 %v1250_v43, %v1266_v45 }
  0x1a   : > { %278 = vperm.xlu0 %7566, %v274_v10   ;;  %7046 = vmatpush3.bf16.msra.mxu0 %v7045_v18  ;;  %v847_v2 = vand.u32 4294901760, %v846_v61  ;;  %v1361_v4 = vsub.f32 %v1251_v44, %v1269_v46  ;;  %v859_v8 = vand.u32 4294901760, %v7860_v59  ;;  %v866_v10 = vand.u32 4294901760, %v7862_v60 }
  0x1b   : > { %7047 = vmatprep.subr.bf16.mxu0 %v7668_v3  ;;  %v7870_v5 = vpack.c.bf16 %v1350_v63, %v1343_v62  ;;  %v854_v6 = vand.u32 4294901760, %v853_v0  ;;  %v1355_v7 = vand.u32 4294901760, %v1354_v1  ;;  %v7926_v30 = vpack.c.bf16 %v1348_v50, %v1341_v49  ;;  %v5420_v62 = vld [vmem:[%s8441_s5] sm:$0xff] }
  0x1c   : > { %v1362_v9 = vand.u32 4294901760, %v1361_v4  ;;  %v860_v14 = vsub.f32 %v7860_v59, %v859_v8  ;;  %v7087_v29 = vpack.c.bf16 %v866_v10, %v859_v8  ;;  %vm1252_vm4 = vcmp.ge.s32.totalorder %v7782_v21, 64 }
  0x1d   : > { %v7066_v11 = vpack.c.bf16 %v854_v6, %v847_v2  ;;  %v1356_v12 = vsub.f32 %v1354_v1, %v1355_v7  ;;  %vm1253_vm5 = vcmp.lt.s32.totalorder %v7782_v21, 96  ;;  %vm5406_vm7 = vcmask 1040384  }
  0x1e   : > { %v1363_v15 = vsub.f32 %v1361_v4, %v1362_v9  ;;  %v861_v18 = vand.u32 4294901760, %v860_v14  ;;  %v7929_v31 = vpack.c.bf16 %v1362_v9, %v1355_v7  ;;  %vm7974_vm6 = vmand %vm1252_vm4, %vm1253_vm5  ;;  %vm5408_vm8 = vcmask 1041408  }
  0x1f   : > { %vm5410_vm9 = vcmask 1042432   ;;  %vm5412_vm10 = vcmask 1043456   ;;  %vm5414_vm11 = vcmask 1044480   ;;  %vm5416_vm12 = vcmask 1045504  }
  0x20   : > { %vm5418_vm13 = vcmask 1046528  }
  0x99   : > { %v279_v22 = vpop.permute.xlu0 %278 }
  0x9a   : > { %vm280_vm2 = vcmp.eq.s32.totalorder %v279_v22, %v7782_v21 }
  0x9b   : > { %v6011_v23 = vsel %vm280_vm2, 1.0, %v7670_v13 }
  0x9c   : > { %v287_v24 = vsel %vm285_vm1, %v6011_v23, 0  ;;  %6351 = vmatmul.mubr.msk.f32.vlgmr.msra.gmra.mrb[0].mxu0 %vm285_vm1, %v6011_v23 }
  0x9d   : > { %7049 = vmatpush3.bf16.msra.mxu0 %v7048_v16  ;;  %6357 = vmatprep.mubr.msk.f32.mxu0 %vm7669_vm0, %v7670_v13  ;;  %v357_v25 = vsub.f32 %v287_v24, %v287_v24  ;;  %v867_v16 = vsub.f32 %v7862_v60, %v866_v10  ;;  %v7886_v24 = vpack.c.bf16 %v7822_v39, %v7820_v38 }
  0x9e   : > { %7050 = vmatprep.subr.bf16.mxu0 %v7668_v3 }
  0x9f   : > { %v358_v26 = vand.u32 4294901760, %v357_v25  ;;  %v868_v20 = vand.u32 4294901760, %v867_v16 }
  0xa1   : > { %v359_v27 = vsub.f32 %v357_v25, %v358_v26 }
  0xa3   : > { %v360_v28 = vand.u32 4294901760, %v359_v27  ;;  %v7075_v27 = vpack.c.bf16 %v7862_v60, %v7860_v59  ;;  %v6015_v60 = vld [vmem:[%s8440_s4] ss:$0 sm:$0xff] }
  0xa4   : > { %6358 = vmatmul.mubr.f32.vlgmr.msra.gmra.mrb[0].mxu0 %v357_v25  ;;  %v7072_v25 = vpack.c.bf16 %v7828_v42, %v7826_v41 }
  0xa5   : > { %7052 = vmatpush3.bf16.msra.mxu0 %v7042_v17  ;;  %6344 = vmatmul.mubr.f32.vlgmr.msra.gmra.mrb[0].mxu1 %v360_v28  ;;  %v7084_v28 = vpack.c.bf16 %v852_v54, %v845_v53 }
  0xa6   : > { %6364 = vmatprep.mubr.msk.f32.mxu0 %vm7669_vm0, %v7670_v13  ;;  %7053 = vmatprep.subr.bf16.mxu0 %v7668_v3 }
  0xa7   : > { %6389 = vmatprep.mubr.msk.f32.mxu1 %vm7669_vm0, %v7670_v13  ;;  %7061 = vmatpush3.bf16.msra.mxu1 %v7824_v40 }
  0xa8   : > { %7062 = vmatprep.subr.bf16.mxu1 %v7668_v3 }
  0xab   : > { %7064 = vmatpush3.bf16.msra.mxu1 %v7858_v58 }
  0xac   : > { %6365 = vmatmul.mubr.f32.vlgmr.msra.gmra.mrb[0].mxu0 %v358_v26  ;;  %7065 = vmatprep.subr.bf16.mxu1 %v7668_v3  ;;  %v7893_v26 = vpack.c.bf16 %v1361_v4, %v1354_v1  ;;  %v7671_v4 = vmov 0.5  }
  0xad   : > { %7055 = vmatpush3.bf16.msra.mxu0 %v7054_v19  ;;  %6371 = vmatprep.mubr.msk.f32.mxu0 %vm7669_vm0, %v7670_v13  ;;  %v1364_v19 = vand.u32 4294901760, %v1363_v15  ;;  %v7982_v6 = vsel %vm7974_vm6, 1.0, %v7671_v4 }
  0xae   : > { %7056 = vmatprep.subr.bf16.mxu0 %v7668_v3 }
  0xb4   : > { %6372 = vmatmul.mubr.msk.f32.vlgmr.msra.gmra.mrb[0].mxu0 %vm285_vm1, %v6011_v23 }
  0xb5   : > { %7058 = vmatpush3.bf16.msra.mxu0 %v7042_v17  ;;  %6378 = vmatprep.mubr.msk.f32.mxu0 %vm7669_vm0, %v7670_v13  ;;  %v1357_v17 = vand.u32 4294901760, %v1356_v12 }
  0xb6   : > { %7095 = vmatprep.subr.bf16.mxu0 %v7668_v3 }
  0xb7   : > { %v7881_v22 = vpack.c.bf16 %v1364_v19, %v1357_v17 }
  0xbc   : > { %6379 = vmatmul.mubr.msk.f32.vlgmr.msra.gmra.mrb[0].mxu0 %vm285_vm1, %v6011_v23  ;;  %v7069_v23 = vpack.c.bf16 %v868_v20, %v861_v18 }
  0xbd   : > { %6455 = vmatprep.mubr.msk.f32.mxu0 %vm7669_vm0, %v7670_v13  ;;  %7097 = vmatpush3.bf16.msra.mxu0 %v7818_v37 }
  0xbe   : > { %7098 = vmatprep.subr.bf16.mxu0 %v7668_v3 }
  0xc1   : > { %7100 = vmatpush3.bf16.msra.mxu0 %v7850_v55 }
  0xc2   : > { %7101 = vmatprep.subr.bf16.mxu0 %v7668_v3 }
  0xc4   : > { %6456 = vmatmul.mubr.f32.vlgmr.msra.gmra.mrb[2].mxu0 %v7670_v13 }
  0xc5   : > { %7103 = vmatpush3.bf16.msra.mxu0 %v7870_v5  ;;  %6466 = vmatprep.mubr.msk.f32.mxu0 %vm7669_vm0, %v7670_v13 }
  0xc6   : > { %7104 = vmatprep.subr.bf16.mxu0 %v7668_v3 }
  0xc9   : > { %7106 = vmatpush3.bf16.msra.mxu0 %v7881_v22 }
  0xca   : > { %7107 = vmatprep.subr.bf16.mxu0 %v7668_v3 }
  0xcc   : > { %6467 = vmatmul.mubr.f32.vlgmr.msra.gmra.mrb[4].mxu0 %v7670_v13 }
  0xcd   : > { %7109 = vmatpush3.bf16.msra.mxu0 %v7886_v24  ;;  %6477 = vmatprep.mubr.msk.f32.mxu0 %vm7669_vm0, %v7670_v13 }
  0xce   : > { %7110 = vmatprep.subr.bf16.mxu0 %v7668_v3 }
  0xd1   : > { %7112 = vmatpush3.bf16.msra.mxu0 %v7893_v26 }
  0xd2   : > { %7113 = vmatprep.subr.bf16.mxu0 %v7668_v3 }
  0xd4   : > { %6478 = vmatmul.mubr.f32.vlgmr.msra.gmra.mrb[6].mxu0 %v7670_v13 }
  0xd5   : > { %7115 = vmatpush3.bf16.msra.mxu0 %v7818_v37  ;;  %6488 = vmatprep.mubr.msk.f32.mxu0 %vm7669_vm0, %v7670_v13 }
  0xd6   : > { %7116 = vmatprep.subr.bf16.mxu0 %v7668_v3 }
  0xd9   : > { %7118 = vmatpush3.bf16.msra.mxu0 %v7850_v55 }
  0xda   : > { %7125 = vmatprep.subr.bf16.mxu0 %v7668_v3 }
  0xdc   : > { %6489 = vmatmul.mubr.f32.vlgmr.msra.gmra.mrb[8].mxu0 %v7670_v13 }
  0xdd   : > { %7127 = vmatpush3.bf16.msra.mxu0 %v7818_v37  ;;  %6510 = vmatprep.mubr.msk.f32.mxu0 %vm7669_vm0, %v7670_v13 }
  0xde   : > { %7128 = vmatprep.subr.bf16.mxu0 %v7668_v3 }
  0xe1   : > { %7130 = vmatpush3.bf16.msra.mxu0 %v7850_v55 }
  0xe2   : > { %7167 = vmatprep.subr.bf16.mxu0 %v7668_v3 }
  0xe4   : > { %6511 = vmatmul.mubr.f32.vlgmr.msra.gmra.mrb[10].mxu0 %v7670_v13 }
  0xe5   : > { %7169 = vmatpush3.bf16.msra.mxu0 %v7818_v37  ;;  %6587 = vmatprep.mubr.msk.f32.mxu0 %vm7669_vm0, %v7670_v13 }
  0xe6   : > { %7170 = vmatprep.subr.bf16.mxu0 %v7668_v3 }
  0xe9   : > { %7172 = vmatpush3.bf16.msra.mxu0 %v7850_v55 }
  0xea   : > { %7173 = vmatprep.subr.bf16.mxu0 %v7668_v3 }
 0x178   : > { %v362_v32 = vpop.f32.mrb[0].mxu1 }
 0x179   : > { %v6345_v33 = vpop.f32.mrb[1].mxu1 }
 0x18f   : > { %v744_v34 = vpop.f32.mrb[0].mxu0 }
 0x190   : > { %v7419_v35 = vadd.f32 %v744_v34, %v362_v32  ;;  %v6380_v36 = vpop.f32.mrb[1].mxu0 }
 0x192   : > { %v761_v41 = vsel %vm759_vm3, %v7419_v35, 0 }
 0x193   : > { %v832_v42 = vand.u32 4294901760, %v761_v41 }
 0x195   : > { %v833_v43 = vsub.f32 %v761_v41, %v832_v42 }
 0x197   : > { %v834_v44 = vand.u32 4294901760, %v833_v43  ;;  %v1334_v39 = vpop.f32.mrb[2].mxu0 }
 0x199   : > { %v835_v38 = vsub.f32 %v833_v43, %v834_v44 }
 0x19b   : > { %v836_v45 = vand.u32 4294901760, %v835_v38 }
 0x19d   : > { %6390 = vmatmul.mubr.f32.vlgmr.msra.gmra.mrb[2].mxu1 %v836_v45 }
 0x19e   : > { %7067 = vmatpush3.bf16.msra.mxu1 %v7066_v11  ;;  %6400 = vmatprep.mubr.msk.f32.mxu1 %vm7669_vm0, %v7670_v13 }
 0x19f   : > { %7068 = vmatprep.subr.bf16.mxu1 %v7668_v3 }
 0x1a2   : > { %7070 = vmatpush3.bf16.msra.mxu1 %v7069_v23 }
 0x1a3   : > { %7071 = vmatprep.subr.bf16.mxu1 %v7668_v3 }
 0x1a5   : > { %6401 = vmatmul.mubr.f32.vlgmr.msra.gmra.mrb[2].mxu1 %v832_v42 }
 0x1a6   : > { %7073 = vmatpush3.bf16.msra.mxu1 %v7072_v25  ;;  %6411 = vmatprep.mubr.msk.f32.mxu1 %vm7669_vm0, %v7670_v13 }
 0x1a7   : > { %7074 = vmatprep.subr.bf16.mxu1 %v7668_v3 }
 0x1aa   : > { %7076 = vmatpush3.bf16.msra.mxu1 %v7075_v27 }
 0x1ab   : > { %7077 = vmatprep.subr.bf16.mxu1 %v7668_v3 }
 0x1ad   : > { %6412 = vmatmul.mubr.f32.vlgmr.msra.gmra.mrb[2].mxu1 %v833_v43 }
 0x1ae   : > { %7079 = vmatpush3.bf16.msra.mxu1 %v7824_v40  ;;  %6422 = vmatprep.mubr.msk.f32.mxu1 %vm7669_vm0, %v7670_v13 }
 0x1af   : > { %7080 = vmatprep.subr.bf16.mxu1 %v7668_v3 }
 0x1b2   : > { %7082 = vmatpush3.bf16.msra.mxu1 %v7858_v58 }
 0x1b3   : > { %7083 = vmatprep.subr.bf16.mxu1 %v7668_v3 }
 0x1b5   : > { %6423 = vmatmul.mubr.f32.vlgmr.msra.gmra.mrb[2].mxu1 %v834_v44 }
 0x1b6   : > { %7085 = vmatpush3.bf16.msra.mxu1 %v7084_v28  ;;  %6433 = vmatprep.mubr.msk.f32.mxu1 %vm7669_vm0, %v7670_v13 }
 0x1b7   : > { %7086 = vmatprep.subr.bf16.mxu1 %v7668_v3 }
 0x1ba   : > { %7088 = vmatpush3.bf16.msra.mxu1 %v7087_v29 }
 0x1bb   : > { %7089 = vmatprep.subr.bf16.mxu1 %v7668_v3 }
 0x1bd   : > { %6434 = vmatmul.mubr.f32.vlgmr.msra.gmra.mrb[2].mxu1 %v832_v42 }
 0x1be   : > { %7091 = vmatpush3.bf16.msra.mxu1 %v7824_v40  ;;  %6444 = vmatprep.mubr.msk.f32.mxu1 %vm7669_vm0, %v7670_v13  ;;  %v6457_v40 = vpop.f32.mrb[3].mxu0 }
 0x1bf   : > { %7092 = vmatprep.subr.bf16.mxu1 %v7668_v3  ;;  %v1425_v46 = vpop.f32.mrb[4].mxu0 }
 0x1c0   : > { %v1426_v47 = vadd.f32 %v1425_v46, %v1334_v39  ;;  %v6468_v48 = vpop.f32.mrb[5].mxu0 }
 0x1c1   : > { %v1505_v49 = vpop.f32.mrb[6].mxu0 }
 0x1c2   : > { %7094 = vmatpush3.bf16.msra.mxu1 %v7858_v58  ;;  %v1506_v50 = vadd.f32 %v1505_v49, %v1426_v47  ;;  %v6479_v51 = vpop.f32.mrb[7].mxu0 }
 0x1c3   : > { %7119 = vmatprep.subr.bf16.mxu1 %v7668_v3  ;;  %v1582_v52 = vpop.f32.mrb[8].mxu0 }
 0x1c4   : > { %v1583_v53 = vadd.f32 %v1582_v52, %v1506_v50  ;;  %v6490_v54 = vpop.f32.mrb[9].mxu0 }
 0x1c5   : > { %6445 = vmatmul.mubr.f32.vlgmr.msra.gmra.mrb[2].mxu1 %v832_v42  ;;  %v1740_v56 = vpop.f32.mrb[10].mxu0 }
 0x1c6   : > { %7121 = vmatpush3.bf16.msra.mxu1 %v7926_v30  ;;  %6499 = vmatprep.mubr.msk.f32.mxu1 %vm7669_vm0, %v7670_v13  ;;  %v6512_v57 = vpop.f32.mrb[11].mxu0 }
 0x1c7   : > { %7122 = vmatprep.subr.bf16.mxu1 %v7668_v3 }
 0x1ca   : > { %7124 = vmatpush3.bf16.msra.mxu1 %v7929_v31 }
 0x1cb   : > { %7131 = vmatprep.subr.bf16.mxu1 %v7668_v3 }
 0x1cd   : > { %6500 = vmatmul.mubr.f32.vlgmr.msra.gmra.mrb[4].mxu1 %v7670_v13 }
 0x1ce   : > { %7133 = vmatpush3.bf16.msra.mxu1 %v7818_v37  ;;  %6521 = vmatprep.mubr.msk.f32.mxu1 %vm7669_vm0, %v7670_v13 }
 0x1cf   : > { %7134 = vmatprep.subr.bf16.mxu1 %v7668_v3 }
 0x1d2   : > { %7136 = vmatpush3.bf16.msra.mxu1 %v7850_v55 }
 0x1d3   : > { %7137 = vmatprep.subr.bf16.mxu1 %v7668_v3 }
 0x298   : > { %v1244_v58 = vpop.f32.mrb[2].mxu1 }
 0x299   : > { %v6446_v59 = vpop.f32.mrb[3].mxu1  ;;  %v7978_v1 = vadd.f32 %v6015_v60, %v1244_v58 }
 0x2a0   : > { %v1665_v61 = vpop.f32.mrb[4].mxu1 }
 0x2a1   : > { %v1666_v63 = vadd.f32 %v1665_v61, %v1583_v53  ;;  %v6501_v0 = vpop.f32.mrb[5].mxu1 }
 0x2a3   : > { %v1741_v2 = vadd.f32 %v1740_v56, %v1666_v63 }
 0x2a5   : > { %v1744_v21 = vadd.f32 %v7978_v1, %v1741_v2 }
 0x2a7   : > { %v1745_v7 = vmul.f32 %v1744_v21, %v7982_v6 }
 0x2a9   : > { %7567 = vtanh.f32 %v1745_v7 }
 0x2b3   : > { %v7568_v8 = vpop.eup %7567 }
 0x2b4   : > { %v1747_v9 = vmul.f32 0.5, %v7568_v8 }
 0x2b6   : > { %v1748_v10 = vadd.f32 0.5, %v1747_v9 }
 0x2b8   : > { %v1749_v11 = vsel %vm7974_vm6, %v7568_v8, %v1748_v10 }
 0x2b9   : > { %1752 = vrot.lane.b32.xlu0 %v1749_v11, %s7672_s9  ;;  %v1750_v15 = vmul.f32 0.0, %v1749_v11 }
 0x32b   : > { %v1753_v12 = vpop.permute.xlu0 %1752 }
 0x32c   : > { %v1755_v14 = vmul.f32 %v1753_v12, %v1749_v11 }
 0x32e   : > { %1757 = vrot.lane.b32.xlu1 %v1755_v14, %s7673_s13 }
 0x3a0   : > { %v1758_v16 = vpop.permute.xlu1 %1757 }
 0x3a1   : > { %v7990_v17 = vadd.f32 %v1758_v16, %v1750_v15 }
 0x3a3   : > { %7569 = vtanh.f32 %v7990_v17  ;;  %v2267_v46 = vrot.slane %v7990_v17, 7 }
 0x3ad   : > { %v7570_v18 = vpop.eup %7569 }
 0x3ae   : > { %1763 = vrot.lane.b32.xlu1 %v7570_v18, %s7672_s9 }
 0x420   : > { %v1764_v19 = vpop.permute.xlu1 %1763 }
 0x421   : > { %v7994_v20 = vmul.f32 %v1764_v19, %v1749_v11 }
 0x423   : > { %1768 = vrot.lane.b32.xlu0 %v7994_v20, %s7673_s13 }
 0x495   : > { %v1769_v23 = vpop.permute.xlu0 %1768 }
 0x496   : > { %v1770_v25 = vsel %vm759_vm3, %v1769_v23, 0 }
 0x497   : > { %v1841_v27 = vand.u32 4294901760, %v1770_v25 }
 0x499   : > { %v1842_v28 = vsub.f32 %v1770_v25, %v1841_v27 }
 0x49b   : > { %v1843_v29 = vand.u32 4294901760, %v1842_v28 }
 0x49d   : > { %v1844_v32 = vsub.f32 %v1842_v28, %v1843_v29 }
 0x49f   : > { %v1845_v33 = vand.u32 4294901760, %v1844_v32 }
 0x4a1   : > { %6522 = vmatmul.mubr.f32.vlgmr.msra.gmra.mrb[6].mxu1 %v1845_v33 }
 0x4a2   : > { %7139 = vmatpush3.bf16.msra.mxu1 %v7870_v5  ;;  %6532 = vmatprep.mubr.msk.f32.mxu1 %vm7669_vm0, %v7670_v13 }
 0x4a3   : > { %7140 = vmatprep.subr.bf16.mxu1 %v7668_v3 }
 0x4a6   : > { %7142 = vmatpush3.bf16.msra.mxu1 %v7881_v22 }
 0x4a7   : > { %7143 = vmatprep.subr.bf16.mxu1 %v7668_v3 }
 0x4a9   : > { %6533 = vmatmul.mubr.f32.vlgmr.msra.gmra.mrb[6].mxu1 %v1841_v27 }
 0x4aa   : > { %7145 = vmatpush3.bf16.msra.mxu1 %v7886_v24  ;;  %6543 = vmatprep.mubr.msk.f32.mxu1 %vm7669_vm0, %v7670_v13 }
 0x4ab   : > { %7146 = vmatprep.subr.bf16.mxu1 %v7668_v3 }
 0x4ae   : > { %7148 = vmatpush3.bf16.msra.mxu1 %v7893_v26 }
 0x4af   : > { %7149 = vmatprep.subr.bf16.mxu1 %v7668_v3 }
 0x4b1   : > { %6544 = vmatmul.mubr.f32.vlgmr.msra.gmra.mrb[6].mxu1 %v1842_v28 }
 0x4b2   : > { %7151 = vmatpush3.bf16.msra.mxu1 %v7818_v37  ;;  %6554 = vmatprep.mubr.msk.f32.mxu1 %vm7669_vm0, %v7670_v13 }
 0x4b3   : > { %7152 = vmatprep.subr.bf16.mxu1 %v7668_v3 }
 0x4b6   : > { %7154 = vmatpush3.bf16.msra.mxu1 %v7850_v55 }
 0x4b7   : > { %7155 = vmatprep.subr.bf16.mxu1 %v7668_v3 }
 0x4b9   : > { %6555 = vmatmul.mubr.f32.vlgmr.msra.gmra.mrb[6].mxu1 %v1843_v29 }
 0x4ba   : > { %7157 = vmatpush3.bf16.msra.mxu1 %v7926_v30  ;;  %6565 = vmatprep.mubr.msk.f32.mxu1 %vm7669_vm0, %v7670_v13 }
 0x4bb   : > { %7158 = vmatprep.subr.bf16.mxu1 %v7668_v3 }
 0x4be   : > { %7160 = vmatpush3.bf16.msra.mxu1 %v7929_v31 }
 0x4bf   : > { %7161 = vmatprep.subr.bf16.mxu1 %v7668_v3 }
 0x4c1   : > { %6566 = vmatmul.mubr.f32.vlgmr.msra.gmra.mrb[6].mxu1 %v1841_v27 }
 0x4c2   : > { %7163 = vmatpush3.bf16.msra.mxu1 %v7818_v37  ;;  %6576 = vmatprep.mubr.msk.f32.mxu1 %vm7669_vm0, %v7670_v13 }
 0x4c3   : > { %7164 = vmatprep.subr.bf16.mxu1 %v7668_v3 }
 0x4c6   : > { %7166 = vmatpush3.bf16.msra.mxu1 %v7850_v55 }
 0x4c7   : > { %7203 = vmatprep.subr.bf16.mxu1 %v7668_v3 }
 0x4c9   : > { %6577 = vmatmul.mubr.f32.vlgmr.msra.gmra.mrb[6].mxu1 %v1841_v27 }
 0x4ca   : > { %7205 = vmatpush3.bf16.msra.mxu1 %v7818_v37  ;;  %6653 = vmatprep.mubr.msk.f32.mxu1 %vm7669_vm0, %v7670_v13 }
 0x4cb   : > { %7206 = vmatprep.subr.bf16.mxu1 %v7668_v3 }
 0x4ce   : > { %7208 = vmatpush3.bf16.msra.mxu1 %v7850_v55 }
 0x4cf   : > { %7209 = vmatprep.subr.bf16.mxu1 %v7668_v3 }
 0x59c   : > { %v2253_v34 = vpop.f32.mrb[6].mxu1 }
 0x59d   : > { %v2258_v35 = vrot.slane %v2253_v34, 7  ;;  %v6578_v36 = vpop.f32.mrb[7].mxu1 }
 0x59f   : > { %v2260_v41 = vadd.f32 %v7978_v1, %v2258_v35 }
 0x5a1   : > { %v2261_v42 = vmul.f32 %v2260_v41, %v7982_v6 }
 0x5a3   : > { %7571 = vtanh.f32 %v2261_v42 }
 0x5ad   : > { %v7572_v43 = vpop.eup %7571 }
 0x5ae   : > { %v2263_v44 = vmul.f32 0.5, %v7572_v43 }
 0x5b0   : > { %v2264_v38 = vadd.f32 0.5, %v2263_v44 }
 0x5b2   : > { %v2265_v45 = vsel %vm7974_vm6, %v7572_v43, %v2264_v38 }
 0x5b3   : > { %2271 = vrot.lane.b32.xlu1 %v2265_v45, %s7672_s9  ;;  %v2269_v47 = vmul.f32 %v2267_v46, %v2265_v45 }
 0x625   : > { %v2272_v39 = vpop.permute.xlu1 %2271 }
 0x626   : > { %v2274_v40 = vmul.f32 %v2272_v39, %v2265_v45 }
 0x628   : > { %2276 = vrot.lane.b32.xlu0 %v2274_v40, %s7673_s13 }
 0x69a   : > { %v2277_v48 = vpop.permute.xlu0 %2276 }
 0x69b   : > { %v8042_v49 = vadd.f32 %v2277_v48, %v2269_v47 }
 0x69d   : > { %7573 = vtanh.f32 %v8042_v49  ;;  %v2787_v14 = vrot.slane %v8042_v49, 7 }
 0x6a7   : > { %v7574_v50 = vpop.eup %7573 }
 0x6a8   : > { %2282 = vrot.lane.b32.xlu1 %v7574_v50, %s7672_s9 }
 0x71a   : > { %v2283_v51 = vpop.permute.xlu1 %2282 }
 0x71b   : > { %v8046_v52 = vmul.f32 %v2283_v51, %v2265_v45 }
 0x71d   : > { %v2287_v53 = vrot.slane %v8046_v52, 1  ;;  %v5407_v25 = vsel %vm5406_vm7, %v7994_v20, %v8046_v52 }
 0x71f   : > { %2288 = vrot.lane.b32.xlu0 %v2287_v53, %s7673_s13 }
 0x791   : > { %v2289_v54 = vpop.permute.xlu0 %2288 }
 0x792   : > { %v2290_v56 = vsel %vm759_vm3, %v2289_v54, 0 }
 0x793   : > { %v2361_v57 = vand.u32 4294901760, %v2290_v56 }
 0x795   : > { %v2362_v58 = vsub.f32 %v2290_v56, %v2361_v57 }
 0x797   : > { %v2363_v59 = vand.u32 4294901760, %v2362_v58 }
 0x799   : > { %v2364_v60 = vsub.f32 %v2362_v58, %v2363_v59 }
 0x79b   : > { %v2365_v61 = vand.u32 4294901760, %v2364_v60 }
 0x79d   : > { %6588 = vmatmul.mubr.f32.vlgmr.msra.gmra.mrb[12].mxu0 %v2365_v61 }
 0x79e   : > { %7175 = vmatpush3.bf16.msra.mxu0 %v7870_v5  ;;  %6598 = vmatprep.mubr.msk.f32.mxu0 %vm7669_vm0, %v7670_v13 }
 0x79f   : > { %7176 = vmatprep.subr.bf16.mxu0 %v7668_v3 }
 0x7a2   : > { %7178 = vmatpush3.bf16.msra.mxu0 %v7881_v22 }
 0x7a3   : > { %7179 = vmatprep.subr.bf16.mxu0 %v7668_v3 }
 0x7a5   : > { %6599 = vmatmul.mubr.f32.vlgmr.msra.gmra.mrb[12].mxu0 %v2361_v57 }
 0x7a6   : > { %7181 = vmatpush3.bf16.msra.mxu0 %v7886_v24  ;;  %6609 = vmatprep.mubr.msk.f32.mxu0 %vm7669_vm0, %v7670_v13 }
 0x7a7   : > { %7182 = vmatprep.subr.bf16.mxu0 %v7668_v3 }
 0x7aa   : > { %7184 = vmatpush3.bf16.msra.mxu0 %v7893_v26 }
 0x7ab   : > { %7185 = vmatprep.subr.bf16.mxu0 %v7668_v3 }
 0x7ad   : > { %6610 = vmatmul.mubr.f32.vlgmr.msra.gmra.mrb[12].mxu0 %v2362_v58 }
 0x7ae   : > { %7187 = vmatpush3.bf16.msra.mxu0 %v7818_v37  ;;  %6620 = vmatprep.mubr.msk.f32.mxu0 %vm7669_vm0, %v7670_v13 }
 0x7af   : > { %7188 = vmatprep.subr.bf16.mxu0 %v7668_v3 }
 0x7b2   : > { %7190 = vmatpush3.bf16.msra.mxu0 %v7850_v55 }
 0x7b3   : > { %7191 = vmatprep.subr.bf16.mxu0 %v7668_v3 }
 0x7b5   : > { %6621 = vmatmul.mubr.f32.vlgmr.msra.gmra.mrb[12].mxu0 %v2363_v59 }
 0x7b6   : > { %7193 = vmatpush3.bf16.msra.mxu0 %v7926_v30  ;;  %6631 = vmatprep.mubr.msk.f32.mxu0 %vm7669_vm0, %v7670_v13 }
 0x7b7   : > { %7194 = vmatprep.subr.bf16.mxu0 %v7668_v3 }
 0x7ba   : > { %7196 = vmatpush3.bf16.msra.mxu0 %v7929_v31 }
 0x7bb   : > { %7197 = vmatprep.subr.bf16.mxu0 %v7668_v3 }
 0x7bd   : > { %6632 = vmatmul.mubr.f32.vlgmr.msra.gmra.mrb[12].mxu0 %v2361_v57 }
 0x7be   : > { %7199 = vmatpush3.bf16.msra.mxu0 %v7818_v37  ;;  %6642 = vmatprep.mubr.msk.f32.mxu0 %vm7669_vm0, %v7670_v13 }
 0x7bf   : > { %7200 = vmatprep.subr.bf16.mxu0 %v7668_v3 }
 0x7c2   : > { %7202 = vmatpush3.bf16.msra.mxu0 %v7850_v55 }
 0x7c3   : > { %7239 = vmatprep.subr.bf16.mxu0 %v7668_v3 }
 0x7c5   : > { %6643 = vmatmul.mubr.f32.vlgmr.msra.gmra.mrb[12].mxu0 %v2361_v57 }
 0x7c6   : > { %7241 = vmatpush3.bf16.msra.mxu0 %v7818_v37  ;;  %6719 = vmatprep.mubr.msk.f32.mxu0 %vm7669_vm0, %v7670_v13 }
 0x7c7   : > { %7242 = vmatprep.subr.bf16.mxu0 %v7668_v3 }
 0x7ca   : > { %7244 = vmatpush3.bf16.msra.mxu0 %v7850_v55 }
 0x7cb   : > { %7245 = vmatprep.subr.bf16.mxu0 %v7668_v3 }
 0x898   : > { %v2773_v63 = vpop.f32.mrb[12].mxu0 }
 0x899   : > { %v2778_v0 = vrot.slane %v2773_v63, 6  ;;  %v6644_v2 = vpop.f32.mrb[13].mxu0 }
 0x89b   : > { %v2780_v4 = vadd.f32 %v7978_v1, %v2778_v0 }
 0x89d   : > { %v2781_v21 = vmul.f32 %v2780_v4, %v7982_v6 }
 0x89f   : > { %7575 = vtanh.f32 %v2781_v21 }
 0x8a9   : > { %v7576_v7 = vpop.eup %7575 }
 0x8aa   : > { %v2783_v8 = vmul.f32 0.5, %v7576_v7 }
 0x8ac   : > { %v2784_v9 = vadd.f32 0.5, %v2783_v8 }
 0x8ae   : > { %v2785_v10 = vsel %vm7974_vm6, %v7576_v7, %v2784_v9 }
 0x8af   : > { %2791 = vrot.lane.b32.xlu1 %v2785_v10, %s7672_s9  ;;  %v2789_v15 = vmul.f32 %v2787_v14, %v2785_v10 }
 0x921   : > { %v2792_v11 = vpop.permute.xlu1 %2791 }
 0x922   : > { %v2794_v12 = vmul.f32 %v2792_v11, %v2785_v10 }
 0x924   : > { %2796 = vrot.lane.b32.xlu0 %v2794_v12, %s7673_s13 }
 0x996   : > { %v2797_v16 = vpop.permute.xlu0 %2796 }
 0x997   : > { %v8094_v17 = vadd.f32 %v2797_v16, %v2789_v15 }
 0x999   : > { %7577 = vtanh.f32 %v8094_v17  ;;  %v3307_v49 = vrot.slane %v8094_v17, 7 }
 0x9a3   : > { %v7578_v18 = vpop.eup %7577 }
 0x9a4   : > { %2802 = vrot.lane.b32.xlu1 %v7578_v18, %s7672_s9 }
 0xa16   : > { %v2803_v19 = vpop.permute.xlu1 %2802 }
 0xa17   : > { %v2805_v23 = vmul.f32 %v2803_v19, %v2785_v10 }
 0xa19   : > { %v2807_v27 = vrot.slane %v2805_v23, 2  ;;  %v8100_v28 = vsel %vm5408_vm8, %v5407_v25, %v2805_v23 }
 0xa1b   : > { %2808 = vrot.lane.b32.xlu0 %v2807_v27, %s7673_s13 }
 0xa8d   : > { %v2809_v29 = vpop.permute.xlu0 %2808 }
 0xa8e   : > { %v2810_v32 = vsel %vm759_vm3, %v2809_v29, 0 }
 0xa8f   : > { %v2881_v33 = vand.u32 4294901760, %v2810_v32 }
 0xa91   : > { %v2882_v34 = vsub.f32 %v2810_v32, %v2881_v33 }
 0xa93   : > { %v2883_v35 = vand.u32 4294901760, %v2882_v34 }
 0xa95   : > { %v2884_v36 = vsub.f32 %v2882_v34, %v2883_v35 }
 0xa97   : > { %v2885_v41 = vand.u32 4294901760, %v2884_v36 }
 0xa99   : > { %6654 = vmatmul.mubr.f32.vlgmr.msra.gmra.mrb[8].mxu1 %v2885_v41 }
 0xa9a   : > { %7211 = vmatpush3.bf16.msra.mxu1 %v7870_v5  ;;  %6664 = vmatprep.mubr.msk.f32.mxu1 %vm7669_vm0, %v7670_v13 }
 0xa9b   : > { %7212 = vmatprep.subr.bf16.mxu1 %v7668_v3 }
 0xa9e   : > { %7214 = vmatpush3.bf16.msra.mxu1 %v7881_v22 }
 0xa9f   : > { %7215 = vmatprep.subr.bf16.mxu1 %v7668_v3 }
 0xaa1   : > { %6665 = vmatmul.mubr.f32.vlgmr.msra.gmra.mrb[8].mxu1 %v2881_v33 }
 0xaa2   : > { %7217 = vmatpush3.bf16.msra.mxu1 %v7886_v24  ;;  %6675 = vmatprep.mubr.msk.f32.mxu1 %vm7669_vm0, %v7670_v13 }
 0xaa3   : > { %7218 = vmatprep.subr.bf16.mxu1 %v7668_v3 }
 0xaa6   : > { %7220 = vmatpush3.bf16.msra.mxu1 %v7893_v26 }
 0xaa7   : > { %7221 = vmatprep.subr.bf16.mxu1 %v7668_v3 }
 0xaa9   : > { %6676 = vmatmul.mubr.f32.vlgmr.msra.gmra.mrb[8].mxu1 %v2882_v34 }
 0xaaa   : > { %7223 = vmatpush3.bf16.msra.mxu1 %v7818_v37  ;;  %6686 = vmatprep.mubr.msk.f32.mxu1 %vm7669_vm0, %v7670_v13 }
 0xaab   : > { %7224 = vmatprep.subr.bf16.mxu1 %v7668_v3 }
 0xaae   : > { %7226 = vmatpush3.bf16.msra.mxu1 %v7850_v55 }
 0xaaf   : > { %7227 = vmatprep.subr.bf16.mxu1 %v7668_v3 }
 0xab1   : > { %6687 = vmatmul.mubr.f32.vlgmr.msra.gmra.mrb[8].mxu1 %v2883_v35 }
 0xab2   : > { %7229 = vmatpush3.bf16.msra.mxu1 %v7926_v30  ;;  %6697 = vmatprep.mubr.msk.f32.mxu1 %vm7669_vm0, %v7670_v13 }
 0xab3   : > { %7230 = vmatprep.subr.bf16.mxu1 %v7668_v3 }
 0xab6   : > { %7232 = vmatpush3.bf16.msra.mxu1 %v7929_v31 }
 0xab7   : > { %7233 = vmatprep.subr.bf16.mxu1 %v7668_v3 }
 0xab9   : > { %6698 = vmatmul.mubr.f32.vlgmr.msra.gmra.mrb[8].mxu1 %v2881_v33 }
 0xaba   : > { %7235 = vmatpush3.bf16.msra.mxu1 %v7818_v37  ;;  %6708 = vmatprep.mubr.msk.f32.mxu1 %vm7669_vm0, %v7670_v13 }
 0xabb   : > { %7236 = vmatprep.subr.bf16.mxu1 %v7668_v3 }
 0xabe   : > { %7238 = vmatpush3.bf16.msra.mxu1 %v7850_v55 }
 0xabf   : > { %7275 = vmatprep.subr.bf16.mxu1 %v7668_v3 }
 0xac1   : > { %6709 = vmatmul.mubr.f32.vlgmr.msra.gmra.mrb[8].mxu1 %v2881_v33 }
 0xac2   : > { %7277 = vmatpush3.bf16.msra.mxu1 %v7818_v37  ;;  %6785 = vmatprep.mubr.msk.f32.mxu1 %vm7669_vm0, %v7670_v13 }
 0xac3   : > { %7278 = vmatprep.subr.bf16.mxu1 %v7668_v3 }
 0xac6   : > { %7280 = vmatpush3.bf16.msra.mxu1 %v7850_v55 }
 0xac7   : > { %7281 = vmatprep.subr.bf16.mxu1 %v7668_v3 }
 0xb94   : > { %v3293_v20 = vpop.f32.mrb[8].mxu1 }
 0xb95   : > { %v3298_v42 = vrot.slane %v3293_v20, 5  ;;  %v6710_v43 = vpop.f32.mrb[9].mxu1 }
 0xb97   : > { %v3300_v44 = vadd.f32 %v7978_v1, %v3298_v42 }
 0xb99   : > { %v3301_v38 = vmul.f32 %v3300_v44, %v7982_v6 }
 0xb9b   : > { %7579 = vtanh.f32 %v3301_v38 }
 0xba5   : > { %v7580_v45 = vpop.eup %7579 }
 0xba6   : > { %v3303_v39 = vmul.f32 0.5, %v7580_v45 }
 0xba8   : > { %v3304_v40 = vadd.f32 0.5, %v3303_v39 }
 0xbaa   : > { %v3305_v46 = vsel %vm7974_vm6, %v7580_v45, %v3304_v40 }
 0xbab   : > { %3311 = vrot.lane.b32.xlu1 %v3305_v46, %s7672_s9  ;;  %v3309_v50 = vmul.f32 %v3307_v49, %v3305_v46 }
 0xc1d   : > { %v3312_v47 = vpop.permute.xlu1 %3311 }
 0xc1e   : > { %v3314_v48 = vmul.f32 %v3312_v47, %v3305_v46 }
 0xc20   : > { %3316 = vrot.lane.b32.xlu0 %v3314_v48, %s7673_s13 }
 0xc92   : > { %v3317_v51 = vpop.permute.xlu0 %3316 }
 0xc93   : > { %v8147_v52 = vadd.f32 %v3317_v51, %v3309_v50 }
 0xc95   : > { %7581 = vtanh.f32 %v8147_v52  ;;  %v3827_v18 = vrot.slane %v8147_v52, 7 }
 0xc9f   : > { %v7582_v53 = vpop.eup %7581 }
 0xca0   : > { %3322 = vrot.lane.b32.xlu1 %v7582_v53, %s7672_s9 }
 0xd12   : > { %v3323_v54 = vpop.permute.xlu1 %3322 }
 0xd13   : > { %v3325_v56 = vmul.f32 %v3323_v54, %v3305_v46 }
 0xd15   : > { %v3327_v57 = vrot.slane %v3325_v56, 3  ;;  %v8152_v58 = vsel %vm5410_vm9, %v8100_v28, %v3325_v56 }
 0xd17   : > { %3328 = vrot.lane.b32.xlu0 %v3327_v57, %s7673_s13 }
 0xd89   : > { %v3329_v59 = vpop.permute.xlu0 %3328 }
 0xd8a   : > { %v3330_v60 = vsel %vm759_vm3, %v3329_v59, 0 }
 0xd8b   : > { %v3401_v61 = vand.u32 4294901760, %v3330_v60 }
 0xd8d   : > { %v3402_v63 = vsub.f32 %v3330_v60, %v3401_v61 }
 0xd8f   : > { %v3403_v0 = vand.u32 4294901760, %v3402_v63 }
 0xd91   : > { %v3404_v2 = vsub.f32 %v3402_v63, %v3403_v0 }
 0xd93   : > { %v3405_v4 = vand.u32 4294901760, %v3404_v2 }
 0xd95   : > { %6720 = vmatmul.mubr.f32.vlgmr.msra.gmra.mrb[14].mxu0 %v3405_v4 }
 0xd96   : > { %7247 = vmatpush3.bf16.msra.mxu0 %v7870_v5  ;;  %6730 = vmatprep.mubr.msk.f32.mxu0 %vm7669_vm0, %v7670_v13 }
 0xd97   : > { %7248 = vmatprep.subr.bf16.mxu0 %v7668_v3 }
 0xd9a   : > { %7250 = vmatpush3.bf16.msra.mxu0 %v7881_v22 }
 0xd9b   : > { %7251 = vmatprep.subr.bf16.mxu0 %v7668_v3 }
 0xd9d   : > { %6731 = vmatmul.mubr.f32.vlgmr.msra.gmra.mrb[14].mxu0 %v3401_v61 }
 0xd9e   : > { %7253 = vmatpush3.bf16.msra.mxu0 %v7886_v24  ;;  %6741 = vmatprep.mubr.msk.f32.mxu0 %vm7669_vm0, %v7670_v13 }
 0xd9f   : > { %7254 = vmatprep.subr.bf16.mxu0 %v7668_v3 }
 0xda2   : > { %7256 = vmatpush3.bf16.msra.mxu0 %v7893_v26 }
 0xda3   : > { %7257 = vmatprep.subr.bf16.mxu0 %v7668_v3 }
 0xda5   : > { %6742 = vmatmul.mubr.f32.vlgmr.msra.gmra.mrb[14].mxu0 %v3402_v63 }
 0xda6   : > { %7259 = vmatpush3.bf16.msra.mxu0 %v7818_v37  ;;  %6752 = vmatprep.mubr.msk.f32.mxu0 %vm7669_vm0, %v7670_v13 }
 0xda7   : > { %7260 = vmatprep.subr.bf16.mxu0 %v7668_v3 }
 0xdaa   : > { %7262 = vmatpush3.bf16.msra.mxu0 %v7850_v55 }
 0xdab   : > { %7263 = vmatprep.subr.bf16.mxu0 %v7668_v3 }
 0xdad   : > { %6753 = vmatmul.mubr.f32.vlgmr.msra.gmra.mrb[14].mxu0 %v3403_v0 }
 0xdae   : > { %7265 = vmatpush3.bf16.msra.mxu0 %v7926_v30  ;;  %6763 = vmatprep.mubr.msk.f32.mxu0 %vm7669_vm0, %v7670_v13 }
 0xdaf   : > { %7266 = vmatprep.subr.bf16.mxu0 %v7668_v3 }
 0xdb2   : > { %7268 = vmatpush3.bf16.msra.mxu0 %v7929_v31 }
 0xdb3   : > { %7269 = vmatprep.subr.bf16.mxu0 %v7668_v3 }
 0xdb5   : > { %6764 = vmatmul.mubr.f32.vlgmr.msra.gmra.mrb[14].mxu0 %v3401_v61 }
 0xdb6   : > { %7271 = vmatpush3.bf16.msra.mxu0 %v7818_v37  ;;  %6774 = vmatprep.mubr.msk.f32.mxu0 %vm7669_vm0, %v7670_v13 }
 0xdb7   : > { %7272 = vmatprep.subr.bf16.mxu0 %v7668_v3 }
 0xdba   : > { %7274 = vmatpush3.bf16.msra.mxu0 %v7850_v55 }
 0xdbb   : > { %7311 = vmatprep.subr.bf16.mxu0 %v7668_v3 }
 0xdbd   : > { %6775 = vmatmul.mubr.f32.vlgmr.msra.gmra.mrb[14].mxu0 %v3401_v61 }
 0xdbe   : > { %7313 = vmatpush3.bf16.msra.mxu0 %v7818_v37  ;;  %6851 = vmatprep.mubr.msk.f32.mxu0 %vm7669_vm0, %v7670_v13 }
 0xdbf   : > { %7314 = vmatprep.subr.bf16.mxu0 %v7668_v3 }
 0xdc2   : > { %7316 = vmatpush3.bf16.msra.mxu0 %v7850_v55 }
 0xdc3   : > { %7317 = vmatprep.subr.bf16.mxu0 %v7668_v3 }
 0xe90   : > { %v3813_v21 = vpop.f32.mrb[14].mxu0 }
 0xe91   : > { %v3818_v7 = vrot.slane %v3813_v21, 4  ;;  %v6776_v8 = vpop.f32.mrb[15].mxu0 }
 0xe93   : > { %v3820_v9 = vadd.f32 %v7978_v1, %v3818_v7 }
 0xe95   : > { %v3821_v10 = vmul.f32 %v3820_v9, %v7982_v6 }
 0xe97   : > { %7583 = vtanh.f32 %v3821_v10 }
 0xea1   : > { %v7584_v11 = vpop.eup %7583 }
 0xea2   : > { %v3823_v12 = vmul.f32 0.5, %v7584_v11 }
 0xea4   : > { %v3824_v14 = vadd.f32 0.5, %v3823_v12 }
 0xea6   : > { %v3825_v15 = vsel %vm7974_vm6, %v7584_v11, %v3824_v14 }
 0xea7   : > { %3831 = vrot.lane.b32.xlu1 %v3825_v15, %s7672_s9  ;;  %v3829_v19 = vmul.f32 %v3827_v18, %v3825_v15 }
 0xf19   : > { %v3832_v16 = vpop.permute.xlu1 %3831 }
 0xf1a   : > { %v3834_v17 = vmul.f32 %v3832_v16, %v3825_v15 }
 0xf1c   : > { %3836 = vrot.lane.b32.xlu0 %v3834_v17, %s7673_s13 }
 0xf8e   : > { %v3837_v23 = vpop.permute.xlu0 %3836 }
 0xf8f   : > { %v8199_v25 = vadd.f32 %v3837_v23, %v3829_v19 }
 0xf91   : > { %7585 = vtanh.f32 %v8199_v25  ;;  %v4347_v52 = vrot.slane %v8199_v25, 7 }
 0xf9b   : > { %v7586_v27 = vpop.eup %7585 }
 0xf9c   : > { %3842 = vrot.lane.b32.xlu1 %v7586_v27, %s7672_s9 }
0x100e   : > { %v3843_v28 = vpop.permute.xlu1 %3842 }
0x100f   : > { %v3845_v29 = vmul.f32 %v3843_v28, %v3825_v15 }
0x1011   : > { %v3847_v32 = vrot.slane %v3845_v29, 4  ;;  %v8204_v33 = vsel %vm5412_vm10, %v8152_v58, %v3845_v29 }
0x1013   : > { %3848 = vrot.lane.b32.xlu0 %v3847_v32, %s7673_s13 }
0x1085   : > { %v3849_v34 = vpop.permute.xlu0 %3848 }
0x1086   : > { %v3850_v35 = vsel %vm759_vm3, %v3849_v34, 0 }
0x1087   : > { %v3921_v36 = vand.u32 4294901760, %v3850_v35 }
0x1089   : > { %v3922_v41 = vsub.f32 %v3850_v35, %v3921_v36 }
0x108b   : > { %v3923_v20 = vand.u32 4294901760, %v3922_v41 }
0x108d   : > { %v3924_v42 = vsub.f32 %v3922_v41, %v3923_v20 }
0x108f   : > { %v3925_v43 = vand.u32 4294901760, %v3924_v42 }
0x1091   : > { %6786 = vmatmul.mubr.f32.vlgmr.msra.gmra.mrb[10].mxu1 %v3925_v43 }
0x1092   : > { %7283 = vmatpush3.bf16.msra.mxu1 %v7870_v5  ;;  %6796 = vmatprep.mubr.msk.f32.mxu1 %vm7669_vm0, %v7670_v13 }
0x1093   : > { %7284 = vmatprep.subr.bf16.mxu1 %v7668_v3 }
0x1096   : > { %7286 = vmatpush3.bf16.msra.mxu1 %v7881_v22 }
0x1097   : > { %7287 = vmatprep.subr.bf16.mxu1 %v7668_v3 }
0x1099   : > { %6797 = vmatmul.mubr.f32.vlgmr.msra.gmra.mrb[10].mxu1 %v3921_v36 }
0x109a   : > { %7289 = vmatpush3.bf16.msra.mxu1 %v7886_v24  ;;  %6807 = vmatprep.mubr.msk.f32.mxu1 %vm7669_vm0, %v7670_v13 }
0x109b   : > { %7290 = vmatprep.subr.bf16.mxu1 %v7668_v3 }
0x109e   : > { %7292 = vmatpush3.bf16.msra.mxu1 %v7893_v26 }
0x109f   : > { %7293 = vmatprep.subr.bf16.mxu1 %v7668_v3 }
0x10a1   : > { %6808 = vmatmul.mubr.f32.vlgmr.msra.gmra.mrb[10].mxu1 %v3922_v41 }
0x10a2   : > { %7295 = vmatpush3.bf16.msra.mxu1 %v7818_v37  ;;  %6818 = vmatprep.mubr.msk.f32.mxu1 %vm7669_vm0, %v7670_v13 }
0x10a3   : > { %7296 = vmatprep.subr.bf16.mxu1 %v7668_v3 }
0x10a6   : > { %7298 = vmatpush3.bf16.msra.mxu1 %v7850_v55 }
0x10a7   : > { %7299 = vmatprep.subr.bf16.mxu1 %v7668_v3 }
0x10a9   : > { %6819 = vmatmul.mubr.f32.vlgmr.msra.gmra.mrb[10].mxu1 %v3923_v20 }
0x10aa   : > { %7301 = vmatpush3.bf16.msra.mxu1 %v7926_v30  ;;  %6829 = vmatprep.mubr.msk.f32.mxu1 %vm7669_vm0, %v7670_v13 }
0x10ab   : > { %7302 = vmatprep.subr.bf16.mxu1 %v7668_v3 }
0x10ae   : > { %7304 = vmatpush3.bf16.msra.mxu1 %v7929_v31 }
0x10af   : > { %7305 = vmatprep.subr.bf16.mxu1 %v7668_v3 }
0x10b1   : > { %6830 = vmatmul.mubr.f32.vlgmr.msra.gmra.mrb[10].mxu1 %v3921_v36 }
0x10b2   : > { %7307 = vmatpush3.bf16.msra.mxu1 %v7818_v37  ;;  %6840 = vmatprep.mubr.msk.f32.mxu1 %vm7669_vm0, %v7670_v13 }
0x10b3   : > { %7308 = vmatprep.subr.bf16.mxu1 %v7668_v3 }
0x10b6   : > { %7310 = vmatpush3.bf16.msra.mxu1 %v7850_v55 }
0x10b7   : > { %7347 = vmatprep.subr.bf16.mxu1 %v7668_v3 }
0x10b9   : > { %6841 = vmatmul.mubr.f32.vlgmr.msra.gmra.mrb[10].mxu1 %v3921_v36 }
0x10ba   : > { %7349 = vmatpush3.bf16.msra.mxu1 %v7818_v37  ;;  %6917 = vmatprep.mubr.msk.f32.mxu1 %vm7669_vm0, %v7670_v13 }
0x10bb   : > { %7350 = vmatprep.subr.bf16.mxu1 %v7668_v3 }
0x10be   : > { %7352 = vmatpush3.bf16.msra.mxu1 %v7850_v55 }
0x10bf   : > { %7353 = vmatprep.subr.bf16.mxu1 %v7668_v3 }
0x118c   : > { %v4333_v44 = vpop.f32.mrb[10].mxu1 }
0x118d   : > { %v4338_v38 = vrot.slane %v4333_v44, 3  ;;  %v6842_v45 = vpop.f32.mrb[11].mxu1 }
0x118f   : > { %v4340_v39 = vadd.f32 %v7978_v1, %v4338_v38 }
0x1191   : > { %v4341_v40 = vmul.f32 %v4340_v39, %v7982_v6 }
0x1193   : > { %7587 = vtanh.f32 %v4341_v40 }
0x119d   : > { %v7588_v46 = vpop.eup %7587 }
0x119e   : > { %v4343_v47 = vmul.f32 0.5, %v7588_v46 }
0x11a0   : > { %v4344_v48 = vadd.f32 0.5, %v4343_v47 }
0x11a2   : > { %v4345_v49 = vsel %vm7974_vm6, %v7588_v46, %v4344_v48 }
0x11a3   : > { %4351 = vrot.lane.b32.xlu1 %v4345_v49, %s7672_s9  ;;  %v4349_v53 = vmul.f32 %v4347_v52, %v4345_v49 }
0x1215   : > { %v4352_v50 = vpop.permute.xlu1 %4351 }
0x1216   : > { %v4354_v51 = vmul.f32 %v4352_v50, %v4345_v49  ;;  %v5421_v50 = vld [vmem:[%s8441_s5 + $0x8] sm:$0xff] }
0x1217   : > { %v5440_v52 = vand.u32 4294901760, %v5421_v50 }
0x1218   : > { %4356 = vrot.lane.b32.xlu0 %v4354_v51, %s7673_s13  ;;  %v5437_v51 = vand.u32 4294901760, %v5420_v62 }
0x128a   : > { %v4357_v54 = vpop.permute.xlu0 %4356 }
0x128b   : > { %v8251_v56 = vadd.f32 %v4357_v54, %v4349_v53  ;;  %v8351_v53 = vpack.c.bf16 %v5440_v52, %v5437_v51  ;;  %v5517_v54 = vsub.f32 %v5420_v62, %v5437_v51 }
0x128d   : > { %7589 = vtanh.f32 %v8251_v56  ;;  %v4867_v25 = vrot.slane %v8251_v56, 7  ;;  %v5524_v56 = vsub.f32 %v5421_v50, %v5440_v52 }
0x1297   : > { %v7590_v57 = vpop.eup %7589 }
0x1298   : > { %4362 = vrot.lane.b32.xlu1 %v7590_v57, %s7672_s9  ;;  %v5422_v57 = vld [vmem:[%s8441_s5 + $0x10] sm:$0xff] }
0x130a   : > { %v4363_v58 = vpop.permute.xlu1 %4362 }
0x130b   : > { %v4365_v59 = vmul.f32 %v4363_v58, %v4345_v49  ;;  %v5423_v58 = vld [vmem:[%s8441_s5 + $0x18] sm:$0xff] }
0x130d   : > { %v4367_v60 = vrot.slane %v4365_v59, 5  ;;  %v8256_v61 = vsel %vm5414_vm11, %v8204_v33, %v4365_v59  ;;  %v5443_v59 = vand.u32 4294901760, %v5422_v57 }
0x130f   : > { %4368 = vrot.lane.b32.xlu0 %v4367_v60, %s7673_s13  ;;  %v5446_v60 = vand.u32 4294901760, %v5423_v58 }
0x1381   : > { %v4369_v63 = vpop.permute.xlu0 %4368 }
0x1382   : > { %v4370_v0 = vsel %vm759_vm3, %v4369_v63, 0  ;;  %v5525_v63 = vand.u32 4294901760, %v5524_v56 }
0x1383   : > { %v4441_v2 = vand.u32 4294901760, %v4370_v0 }
0x1385   : > { %v4442_v4 = vsub.f32 %v4370_v0, %v4441_v2  ;;  %v7387_v0 = vpack.c.bf16 %v5446_v60, %v5443_v59 }
0x1387   : > { %v4443_v21 = vand.u32 4294901760, %v4442_v4 }
0x1389   : > { %v4444_v7 = vsub.f32 %v4442_v4, %v4443_v21 }
0x138b   : > { %v4445_v8 = vand.u32 4294901760, %v4444_v7  ;;  %v5526_v7 = vsub.f32 %v5524_v56, %v5525_v63 }
0x138d   : > { %6852 = vmatmul.mubr.f32.vlgmr.msra.gmra.mrb[16].mxu0 %v4445_v8 }
0x138e   : > { %7319 = vmatpush3.bf16.msra.mxu0 %v7870_v5  ;;  %6862 = vmatprep.mubr.msk.f32.mxu0 %vm7669_vm0, %v7670_v13 }
0x138f   : > { %7320 = vmatprep.subr.bf16.mxu0 %v7668_v3 }
0x1392   : > { %7322 = vmatpush3.bf16.msra.mxu0 %v7881_v22 }
0x1393   : > { %7323 = vmatprep.subr.bf16.mxu0 %v7668_v3 }
0x1395   : > { %6863 = vmatmul.mubr.f32.vlgmr.msra.gmra.mrb[16].mxu0 %v4441_v2 }
0x1396   : > { %7325 = vmatpush3.bf16.msra.mxu0 %v7886_v24  ;;  %6873 = vmatprep.mubr.msk.f32.mxu0 %vm7669_vm0, %v7670_v13 }
0x1397   : > { %7326 = vmatprep.subr.bf16.mxu0 %v7668_v3 }
0x139a   : > { %7328 = vmatpush3.bf16.msra.mxu0 %v7893_v26 }
0x139b   : > { %7329 = vmatprep.subr.bf16.mxu0 %v7668_v3 }
0x139d   : > { %6874 = vmatmul.mubr.f32.vlgmr.msra.gmra.mrb[16].mxu0 %v4442_v4  ;;  %v5538_v4 = vsub.f32 %v5423_v58, %v5446_v60 }
0x139e   : > { %7331 = vmatpush3.bf16.msra.mxu0 %v7818_v37  ;;  %6884 = vmatprep.mubr.msk.f32.mxu0 %vm7669_vm0, %v7670_v13 }
0x139f   : > { %7332 = vmatprep.subr.bf16.mxu0 %v7668_v3 }
0x13a2   : > { %7334 = vmatpush3.bf16.msra.mxu0 %v7850_v55 }
0x13a3   : > { %7335 = vmatprep.subr.bf16.mxu0 %v7668_v3 }
0x13a5   : > { %6885 = vmatmul.mubr.f32.vlgmr.msra.gmra.mrb[16].mxu0 %v4443_v21 }
0x13a6   : > { %7337 = vmatpush3.bf16.msra.mxu0 %v7926_v30  ;;  %6895 = vmatprep.mubr.msk.f32.mxu0 %vm7669_vm0, %v7670_v13 }
0x13a7   : > { %7338 = vmatprep.subr.bf16.mxu0 %v7668_v3 }
0x13aa   : > { %7340 = vmatpush3.bf16.msra.mxu0 %v7929_v31 }
0x13ab   : > { %7341 = vmatprep.subr.bf16.mxu0 %v7668_v3 }
0x13ad   : > { %6896 = vmatmul.mubr.f32.vlgmr.msra.gmra.mrb[16].mxu0 %v4441_v2 }
0x13ae   : > { %7343 = vmatpush3.bf16.msra.mxu0 %v7818_v37  ;;  %6906 = vmatprep.mubr.msk.f32.mxu0 %vm7669_vm0, %v7670_v13 }
0x13af   : > { %7344 = vmatprep.subr.bf16.mxu0 %v7668_v3 }
0x13b2   : > { %7346 = vmatpush3.bf16.msra.mxu0 %v7850_v55 }
0x13b3   : > { %7383 = vmatprep.subr.bf16.mxu0 %v7668_v3 }
0x13b5   : > { %6907 = vmatmul.mubr.f32.vlgmr.msra.gmra.mrb[16].mxu0 %v4441_v2  ;;  %v5531_v2 = vsub.f32 %v5422_v57, %v5443_v59 }
0x13b6   : > { %6983 = vmatprep.mubr.msk.f32.mxu0 %vm7669_vm0, %v7670_v13  ;;  %7385 = vmatpush3.bf16.msra.mxu0 %v8351_v53 }
0x13b7   : > { %7386 = vmatprep.subr.bf16.mxu0 %v7668_v3 }
0x13ba   : > { %7388 = vmatpush3.bf16.msra.mxu0 %v7387_v0 }
0x13bb   : > { %7389 = vmatprep.subr.bf16.mxu0 %v7668_v3 }
0x1488   : > { %v4853_v9 = vpop.f32.mrb[16].mxu0 }
0x1489   : > { %v4858_v10 = vrot.slane %v4853_v9, 2  ;;  %v6908_v11 = vpop.f32.mrb[17].mxu0  ;;  %v5532_v9 = vand.u32 4294901760, %v5531_v2 }
0x148b   : > { %v4860_v12 = vadd.f32 %v7978_v1, %v4858_v10  ;;  %v5539_v10 = vand.u32 4294901760, %v5538_v4 }
0x148d   : > { %v4861_v14 = vmul.f32 %v4860_v12, %v7982_v6  ;;  %v5527_v12 = vand.u32 4294901760, %v5526_v7 }
0x148f   : > { %7591 = vtanh.f32 %v4861_v14 }
0x1499   : > { %v7592_v15 = vpop.eup %7591 }
0x149a   : > { %v4863_v16 = vmul.f32 0.5, %v7592_v15 }
0x149c   : > { %v4864_v17 = vadd.f32 0.5, %v4863_v16  ;;  %v5540_v16 = vsub.f32 %v5538_v4, %v5539_v10 }
0x149e   : > { %v4865_v18 = vsel %vm7974_vm6, %v7592_v15, %v4864_v17  ;;  %v5533_v15 = vsub.f32 %v5531_v2, %v5532_v9 }
0x149f   : > { %4871 = vrot.lane.b32.xlu1 %v4865_v18, %s7672_s9  ;;  %v4869_v27 = vmul.f32 %v4867_v25, %v4865_v18 }
0x1511   : > { %v4872_v19 = vpop.permute.xlu1 %4871 }
0x1512   : > { %v4874_v23 = vmul.f32 %v4872_v19, %v4865_v18  ;;  %v5534_v19 = vand.u32 4294901760, %v5533_v15 }
0x1514   : > { %4876 = vrot.lane.b32.xlu0 %v4874_v23, %s7673_s13  ;;  %v5541_v23 = vand.u32 4294901760, %v5540_v16 }
0x1516   : > { %v7393_v25 = vpack.c.bf16 %v5541_v23, %v5534_v19 }
0x1586   : > { %v4877_v28 = vpop.permute.xlu0 %4876 }
0x1587   : > { %v8299_v29 = vadd.f32 %v4877_v28, %v4869_v27  ;;  %v7396_v27 = vpack.c.bf16 %v5524_v56, %v5517_v54  ;;  %v7399_v28 = vpack.c.bf16 %v5538_v4, %v5531_v2 }
0x1589   : > { %7593 = vtanh.f32 %v8299_v29 }
0x1593   : > { %v7594_v32 = vpop.eup %7593 }
0x1594   : > { %4882 = vrot.lane.b32.xlu1 %v7594_v32, %s7672_s9  ;;  %v7411_v32 = vpack.c.bf16 %v5539_v10, %v5532_v9 }
0x1606   : > { %v4883_v33 = vpop.permute.xlu1 %4882 }
0x1607   : > { %v4885_v34 = vmul.f32 %v4883_v33, %v4865_v18 }
0x1609   : > { %v4887_v35 = vrot.slane %v4885_v34, 6  ;;  %v8304_v36 = vsel %vm5416_vm12, %v8256_v61, %v4885_v34  ;;  %v5518_v61 = vand.u32 4294901760, %v5517_v54 }
0x160b   : > { %4888 = vrot.lane.b32.xlu0 %v4887_v35, %s7673_s13  ;;  %v5519_v21 = vsub.f32 %v5517_v54, %v5518_v61 }
0x160d   : > { %v5520_v8 = vand.u32 4294901760, %v5519_v21 }
0x160f   : > { %v7390_v17 = vpack.c.bf16 %v5527_v12, %v5520_v8 }
0x167d   : > { %v4889_v41 = vpop.permute.xlu0 %4888 }
0x167e   : > { %v4890_v20 = vsel %vm759_vm3, %v4889_v41, 0 }
0x167f   : > { %v4961_v42 = vand.u32 4294901760, %v4890_v20 }
0x1681   : > { %v4962_v43 = vsub.f32 %v4890_v20, %v4961_v42 }
0x1683   : > { %v4963_v44 = vand.u32 4294901760, %v4962_v43 }
0x1685   : > { %v4964_v38 = vsub.f32 %v4962_v43, %v4963_v44 }
0x1687   : > { %v4965_v45 = vand.u32 4294901760, %v4964_v38 }
0x1689   : > { %6918 = vmatmul.mubr.f32.vlgmr.msra.gmra.mrb[12].mxu1 %v4965_v45 }
0x168a   : > { %7355 = vmatpush3.bf16.msra.mxu1 %v7870_v5  ;;  %6928 = vmatprep.mubr.msk.f32.mxu1 %vm7669_vm0, %v7670_v13 }
0x168b   : > { %7356 = vmatprep.subr.bf16.mxu1 %v7668_v3 }
0x168e   : > { %7358 = vmatpush3.bf16.msra.mxu1 %v7881_v22 }
0x168f   : > { %7359 = vmatprep.subr.bf16.mxu1 %v7668_v3 }
0x1691   : > { %6929 = vmatmul.mubr.f32.vlgmr.msra.gmra.mrb[12].mxu1 %v4961_v42 }
0x1692   : > { %7361 = vmatpush3.bf16.msra.mxu1 %v7886_v24  ;;  %6939 = vmatprep.mubr.msk.f32.mxu1 %vm7669_vm0, %v7670_v13 }
0x1693   : > { %7362 = vmatprep.subr.bf16.mxu1 %v7668_v3 }
0x1696   : > { %7364 = vmatpush3.bf16.msra.mxu1 %v7893_v26 }
0x1697   : > { %7365 = vmatprep.subr.bf16.mxu1 %v7668_v3 }
0x1699   : > { %6940 = vmatmul.mubr.f32.vlgmr.msra.gmra.mrb[12].mxu1 %v4962_v43 }
0x169a   : > { %7367 = vmatpush3.bf16.msra.mxu1 %v7818_v37  ;;  %6950 = vmatprep.mubr.msk.f32.mxu1 %vm7669_vm0, %v7670_v13 }
0x169b   : > { %7368 = vmatprep.subr.bf16.mxu1 %v7668_v3 }
0x169e   : > { %7370 = vmatpush3.bf16.msra.mxu1 %v7850_v55 }
0x169f   : > { %7371 = vmatprep.subr.bf16.mxu1 %v7668_v3 }
0x16a1   : > { %6951 = vmatmul.mubr.f32.vlgmr.msra.gmra.mrb[12].mxu1 %v4963_v44 }
0x16a2   : > { %7373 = vmatpush3.bf16.msra.mxu1 %v7926_v30  ;;  %6961 = vmatprep.mubr.msk.f32.mxu1 %vm7669_vm0, %v7670_v13 }
0x16a3   : > { %7374 = vmatprep.subr.bf16.mxu1 %v7668_v3 }
0x16a6   : > { %7376 = vmatpush3.bf16.msra.mxu1 %v7929_v31 }
0x16a7   : > { %7377 = vmatprep.subr.bf16.mxu1 %v7668_v3 }
0x16a9   : > { %6962 = vmatmul.mubr.f32.vlgmr.msra.gmra.mrb[12].mxu1 %v4961_v42 }
0x16aa   : > { %7379 = vmatpush3.bf16.msra.mxu1 %v7818_v37  ;;  %6972 = vmatprep.mubr.msk.f32.mxu1 %vm7669_vm0, %v7670_v13 }
0x16ab   : > { %7380 = vmatprep.subr.bf16.mxu1 %v7668_v3 }
0x16ae   : > { %7382 = vmatpush3.bf16.msra.mxu1 %v7850_v55  ;;  %v5387_v55 = vrot.slane %v8299_v29, 7  ;;  %v7408_v29 = vpack.c.bf16 %v5525_v63, %v5518_v61 }
0x16b1   : > { %6973 = vmatmul.mubr.f32.vlgmr.msra.gmra.mrb[12].mxu1 %v4961_v42 }
0x1784   : > { %v5373_v5 = vpop.f32.mrb[12].mxu1 }
0x1785   : > { %v5378_v22 = vrot.slane %v5373_v5, 1  ;;  %v6974_v24 = vpop.f32.mrb[13].mxu1 }
0x1787   : > { %v5380_v26 = vadd.f32 %v7978_v1, %v5378_v22 }
0x1789   : > { %v5381_v30 = vmul.f32 %v5380_v26, %v7982_v6 }
0x178b   : > { %7595 = vtanh.f32 %v5381_v30 }
0x1795   : > { %v7596_v31 = vpop.eup %7595 }
0x1796   : > { %v5383_v39 = vmul.f32 0.5, %v7596_v31 }
0x1798   : > { %v5384_v40 = vadd.f32 0.5, %v5383_v39 }
0x179a   : > { %v5385_v37 = vsel %vm7974_vm6, %v7596_v31, %v5384_v40 }
0x179b   : > { %5391 = vrot.lane.b32.xlu1 %v5385_v37, %s7672_s9  ;;  %v5389_v48 = vmul.f32 %v5387_v55, %v5385_v37 }
0x180d   : > { %v5392_v46 = vpop.permute.xlu1 %5391 }
0x180e   : > { %v5394_v47 = vmul.f32 %v5392_v46, %v5385_v37 }
0x1810   : > { %5396 = vrot.lane.b32.xlu0 %v5394_v47, %s7673_s13 }
0x1882   : > { %v5397_v49 = vpop.permute.xlu0 %5396 }
0x1883   : > { %v5399_v1 = vadd.f32 %v5397_v49, %v5389_v48 }
0x1885   : > { %7597 = vtanh.f32 %v5399_v1 }
0x188f   : > { %v7598_v6 = vpop.eup %7597 }
0x1890   : > { %5402 = vrot.lane.b32.xlu1 %v7598_v6, %s7672_s9  ;;  %s6018_s9 = sshll.u32 %s7736_s28, 7  ;;  %s7674_s28 = smov [#allocation2]  }
0x1891   : > { %s8394_s17 = scalar_lea.hbm %s8443_s7, %s6018_s9  ;;  %s7607_s20 = sshll.u32 %s7674_s28, 4  ;;  %s7608_s20 = int_to_ptr.vmem [resolvable:$false] %s7607_s20 }
0x1892   : > { %s7609_s21 = scalar_lea.vmem %s7608_s20, 256 }
0x1902   : > { %v5403_v11 = vpop.permute.xlu1 %5402 }
0x1903   : > { %v5405_v14 = vmul.f32 %v5403_v11, %v5385_v37 }
0x1905   : > { %v5419_v18 = vsel %vm5418_vm13, %v8304_v36, %v5405_v14  ;;  %v6016_v36 = vld [vmem:[%s8442_s6] ss:$0 sm:$0xff] }
0x1906   : > { %5432 = vrot.lane.b32.xlu0 %v5419_v18, %s7673_s13  ;;  %s269_s13 = scalar_lea.vmem [#allocation2], %s6009_s8 }
0x1907   : > { %s5946_s14 = sshll.u32 %s269_s13, 4  ;;  %s8396_s14 = int_to_ptr.vmem [resolvable:$true] %s5946_s14 }
0x1908   : > { %s7603_s19 = scalar_lea.vmem %s8396_s14, 128  ;;  %p7610_p0 = scmp.lt.s32.totalorder %s8396_s14, %s7608_s20 }
0x1909   : > { %p7604_p11 = scmp.ne.s32.totalorder %s8396_s14, %s7603_s19  ;;  %p7611_p1 = scmp.lt.s32.totalorder %s7609_s21, %s7603_s19 }
0x190b   : > { %p7605_p12 = pnand %p7604_p11, %p7753_p5  ;;  %p7612_p2 = por %p7611_p1, %p7610_p0 }
0x190d   : > { %p7606_p13 = pneg %p7605_p12 }
0x190f   : > { %p7613_p3 = pnand %p7612_p2, %p7606_p13 }
0x1978   : > { %v5433_v33 = vpop.permute.xlu0 %5432 }
0x1979   : > { %v5434_v34 = vsel %vm759_vm3, %v5433_v33, 0 }
0x197a   : > { %v5505_v35 = vand.u32 4294901760, %v5434_v34 }
0x197c   : > { %v5506_v41 = vsub.f32 %v5434_v34, %v5505_v35 }
0x197e   : > { %v5507_v20 = vand.u32 4294901760, %v5506_v41 }
0x1980   : > { %v5508_v42 = vsub.f32 %v5506_v41, %v5507_v20 }
0x1982   : > { %v5509_v43 = vand.u32 4294901760, %v5508_v42 }
0x1984   : > { %6984 = vmatmul.mubr.f32.vlgmr.msra.gmra.mrb[18].mxu0 %v5509_v43 }
0x1985   : > { %7391 = vmatpush3.bf16.msra.mxu0 %v7390_v17  ;;  %6994 = vmatprep.mubr.msk.f32.mxu0 %vm7669_vm0, %v7670_v13 }
0x1986   : > { %7392 = vmatprep.subr.bf16.mxu0 %v7668_v3 }
0x1989   : > { %7394 = vmatpush3.bf16.msra.mxu0 %v7393_v25 }
0x198a   : > { %7395 = vmatprep.subr.bf16.mxu0 %v7668_v3 }
0x198c   : > { %6995 = vmatmul.mubr.f32.vlgmr.msra.gmra.mrb[18].mxu0 %v5505_v35 }
0x198d   : > { %7397 = vmatpush3.bf16.msra.mxu0 %v7396_v27  ;;  %7005 = vmatprep.mubr.msk.f32.mxu0 %vm7669_vm0, %v7670_v13 }
0x198e   : > { %7398 = vmatprep.subr.bf16.mxu0 %v7668_v3 }
0x1991   : > { %7400 = vmatpush3.bf16.msra.mxu0 %v7399_v28 }
0x1992   : > { %7401 = vmatprep.subr.bf16.mxu0 %v7668_v3 }
0x1994   : > { %7006 = vmatmul.mubr.f32.vlgmr.msra.gmra.mrb[18].mxu0 %v5506_v41 }
0x1995   : > { %7403 = vmatpush3.bf16.msra.mxu0 %v8351_v53  ;;  %7016 = vmatprep.mubr.msk.f32.mxu0 %vm7669_vm0, %v7670_v13 }
0x1996   : > { %7404 = vmatprep.subr.bf16.mxu0 %v7668_v3 }
0x1999   : > { %7406 = vmatpush3.bf16.msra.mxu0 %v7387_v0 }
0x199a   : > { %7407 = vmatprep.subr.bf16.mxu0 %v7668_v3 }
0x199c   : > { %7017 = vmatmul.mubr.f32.vlgmr.msra.gmra.mrb[18].mxu0 %v5507_v20 }
0x199d   : > { %7409 = vmatpush3.bf16.msra.mxu0 %v7408_v29  ;;  %7027 = vmatprep.mubr.msk.f32.mxu0 %vm7669_vm0, %v7670_v13 }
0x199e   : > { %7410 = vmatprep.subr.bf16.mxu0 %v7668_v3 }
0x19a1   : > { %7412 = vmatpush3.bf16.msra.mxu0 %v7411_v32 }
0x19a2   : > { %7413 = vmatprep.subr.bf16.mxu0 %v7668_v3 }
0x19a4   : > { %7028 = vmatmul.mubr.f32.vlgmr.msra.gmra.mrb[18].mxu0 %v5505_v35 }
0x19a5   : > { %7415 = vmatpush3.bf16.msra.mxu0 %v8351_v53  ;;  %7038 = vmatprep.mubr.msk.f32.mxu0 %vm7669_vm0, %v7670_v13 }
0x19a6   : > { %7416 = vmatprep.subr.bf16.mxu0 %v7668_v3 }
0x19a9   : > { %7418 = vmatpush3.bf16.msra.mxu0 %v7387_v0 }
0x19ac   : > { %7039 = vmatmul.mubr.f32.vlgmr.msra.gmra.mrb[18].mxu0 %v5505_v35 }
0x1a7f   : > { %v5917_v44 = vpop.f32.mrb[18].mxu0 }
0x1a80   : > { %v7421_v38 = vadd.f32 %v6016_v36, %v5917_v44  ;;  %v7040_v45 = vpop.f32.mrb[19].mxu0 }
0x1a82   : > { %5921 = vmax.xlane.f32.xlu1 %v7421_v38 }
0x1b0f   : > { %v5922_v5 = vpop.xlane.xlu1 %5921 }
0x1b10   : > { %v5923_v22 = vsub.f32 %v7421_v38, %v5922_v5 }
0x1b12   : > { %v5924_v24 = vmul.f32 1.442695, %v5923_v22 }
0x1b14   : > { %7599 = vpow2.f32 %v5924_v24 }
0x1b1e   : > { %v7600_v26 = vpop.eup %7599 }
0x1b1f   : > { %5926 = vadd.xlane.f32.xlu0 %v7600_v26 }
0x1bac   : > { %v5927_v13 = vpop.xlane.xlu0 %5926 }
0x1bad   : > { %7601 = vlog2.f32 %v5927_v13 }
0x1bb7   : > { %v7602_v3 = vpop.eup %7601 }
0x1bb8   : > { %v5929_v30 = vmul.f32 0.6931472, %v7602_v3 }
0x1bba   : > { %v5930_v31 = vsub.f32 %v5923_v22, %v5929_v30 }
0x1bbc   : > { %5931 = vst [vmem:[%s269_s13] sm:$0xff] %v5930_v31 }
0x1bbd   : > { %7616 = shalt.err (!%p7613_p3)
}
0x1bbe   : > { %s7617_s22 = scalar_lea.hbm %s8394_s17, 128  ;;  %s7621_s8 = scalar_lea.hbm %s8443_s7, 256 }
0x1bbf   : > { %p7618_p4 = scmp.ne.s32.totalorder %s8394_s17, %s7617_s22  ;;  %p7622_p9 = scmp.lt.u32.totalorder %s8394_s17, %s8443_s7 }
0x1bc0   : > { %p7623_p10 = scmp.lt.u32.totalorder %s7621_s8, %s7617_s22  ;;  %p7625_p12 = scmp.lt.u32.totalorder %s7617_s22, %s8394_s17 }
0x1bc1   : > { %p7619_p7 = pnand %p7618_p4, %p7753_p5 }
0x1bc2   : > { %p7624_p11 = por %p7623_p10, %p7622_p9 }
0x1bc3   : > { %p7620_p8 = pneg %p7619_p7 }
0x1bc4   : > { %p7626_p13 = por %p7625_p12, %p7624_p11 }
0x1bc6   : > { %p7627_p0 = pnand %p7626_p13, %p7620_p8 }
0x1bc8   : > { %7630 = shalt.err (!%p7627_p0)
}
0x1bc9   : > { %7520 = dma.vmem_to_hbm [thread:$0]  (%p7753_p5), %s8396_s14, 128, %s8394_s17, %s5933_s18  }
0x1bca PF: > { %p7526_p1 = scmp.ge.s32.totalorder %s7665_s27, 2  ;;  %s5958_s15 = sand.u32 1, %s7653_s24  }
0x1bcb   : > { %s5959_s16 = scalar_lea.sflag [#allocation3], %s5958_s15 }
0x1bcc   : > { %p7523_p2 = pnand %p7526_p1, %p7757_p6 }
0x1bce   : > { %7648 = dma.done.wait (!%p7523_p2), %s5959_s16, 128  }
0x1bcf   : > { %7650 = vsyncadd (!%p7523_p2), %s5959_s16, 4294967168  ;;  %p17_p3 = scmp.ge.s32.totalorder %s7740_s30, 4   ;;  %s8448_s24 = smov %s7657_s25 }
0x1bd0   : > { %s8449_s25 = smov %s7661_s26  ;;  %s8450_s26 = smov %s7751_s10 }
0x1bd1   : > { %s8451_s27 = smov %s7740_s30  ;;  %19 = sbr.rel (!%p17_p3) target bundleno = 3 (0x3), region = 83 }
0x1bd8   :  { %5964 = vsyncpa [#allocation3], 1 }
0x1bd9   :  { %5966 = vsyncpa [#allocation3 + $0x1], 1 }

</bundles_post_ra>
